<compile_context>
chip_gen: v6e
topology: v6e:2x2x1
jax: 0.10.0
libtpu: 0.0.40
codegen_flags: <defaults>
</compile_context>

<pallas_src>
from functools import partial

import jax
import jax.numpy as jnp
from jax.experimental import pallas as pl
from jax.experimental.pallas import tpu as pltpu


def attention_kernel(x_ref, wqkv_ref, wproj_ref, pb_ref,
                     avg_ref, out_ref,
                     qkv_ref, ctx_ref, *, num_heads, head_dim):
    Bt, N, C = x_ref.shape

    # Fused lane-dense QKV projection; bf16 operands, f32 accumulation,
    # stored bf16 so the per-head reads are MXU-ready.
    x2d = x_ref[...].reshape(Bt * N, C).astype(jnp.bfloat16)
    qkv_ref[...] = jnp.dot(
        x2d, wqkv_ref[...], preferred_element_type=jnp.float32
    ).astype(jnp.bfloat16)

    avg_acc = None  # row-0 head-average accumulator (kept in vregs)

    # Static unroll of the head loop (num_heads is a compile-time constant).
    for h in range(num_heads):
        qo = h * head_dim
        qh = qkv_ref[:, qo:qo + head_dim].reshape(Bt, N, head_dim)
        kh = qkv_ref[:, C + qo:C + qo + head_dim].reshape(Bt, N, head_dim)
        vh = qkv_ref[:, 2 * C + qo:2 * C + qo + head_dim].reshape(Bt, N, head_dim)

        # Batched Q @ K^T (softmax scale already folded into the Q columns).
        s = jnp.einsum('bqd,bkd->bqk', qh, kh,
                       preferred_element_type=jnp.float32)       # (Bt, N, N) f32

        # Numerically stable softmax along the last axis (f32).
        m = jnp.max(s, axis=-1, keepdims=True)
        e = jnp.exp(s - m)
        l = jnp.sum(e, axis=-1, keepdims=True)

        # Row 0 of the head-averaged attention: exact reciprocal (1 row/batch).
        row0 = e[:, 0:1, :] / l[:, 0:1, :]
        avg_acc = row0 if avg_acc is None else avg_acc + row0

        # Probabilities for attn @ V: EUP approx reciprocal, bf16 MXU feed.
        probs = (e * pl.reciprocal(l, approx=True)).astype(jnp.bfloat16)
        ctx_h = jnp.einsum('bqk,bkd->bqd', probs, vh,
                           preferred_element_type=jnp.float32)   # (Bt, N, hd)
        ctx_ref[:, qo:qo + head_dim] = (
            ctx_h.reshape(Bt * N, head_dim).astype(jnp.bfloat16))

    avg_ref[...] = avg_acc * (1.0 / num_heads)

    # Single lane-dense out-projection with a full C-deep contraction + bias.
    out = jnp.dot(ctx_ref[...], wproj_ref[...],
                  preferred_element_type=jnp.float32) + pb_ref[...]
    out_ref[...] = out.reshape(Bt, N, C).astype(out_ref.dtype)


def _pick_batch_tile(B, N):
    # Block enough batch elements per grid step that matmuls have >= ~256 rows.
    target_rows = 256
    bt = max(1, min(B, target_rows // max(N, 1)))
    while B % bt:
        bt -= 1
    return bt


def _vmem_limit_bytes():
    # Generation-aware VMEM budget: leave headroom on v7x (64 MiB / TC),
    # allow larger blocks on v5e/v6e (128 MiB).
    try:
        cap = pltpu.get_tpu_info().vmem_capacity_bytes
    except Exception:
        cap = 64 * 1024 * 1024
    return int(min(cap * 3 // 4, 100 * 1024 * 1024))


def attention_forward(x, qkv_w, proj_w, proj_b, *, num_heads):
    """x: (B, N, C); qkv_w: (3C, C); proj_w: (C, C); proj_b: (C,)."""
    B, N, C = x.shape
    assert C % num_heads == 0
    hd = C // num_heads
    scale = hd ** -0.5

    # Fused (C, 3C) QKV weight, lane-dense; scale folded into Q columns in f32
    # before the bf16 cast (single rounding, per review correctness note).
    col_scale = jnp.concatenate([jnp.full((C,), scale, jnp.float32),
                                 jnp.ones((2 * C,), jnp.float32)])
    wqkv = (qkv_w.T.astype(jnp.float32) * col_scale[None, :]).astype(jnp.bfloat16)
    wproj = proj_w.T.astype(jnp.bfloat16)                    # (C, C)
    pb = proj_b.astype(jnp.float32).reshape(1, C)

    Bt = _pick_batch_tile(B, N)
    grid = (B // Bt,)

    kernel = partial(attention_kernel, num_heads=num_heads, head_dim=hd)

    # TODO(synk): for very large N, add flash-style K-tiling (streaming softmax)
    # plus a second "parallel" query-tile grid axis so both v7x TensorCores stay
    # busy when B // Bt is 1 or odd.
    # TODO(synk): single-buffer the grid-invariant weight inputs with
    # pipeline_mode=pl.Buffered(1) once confirmed on the target jax version; at
    # large C this halves resident weight VMEM.
    avg_row, out = pl.pallas_call(
        kernel,
        out_shape=(jax.ShapeDtypeStruct((B, 1, N), jnp.float32),
                   jax.ShapeDtypeStruct((B, N, C), x.dtype)),
        grid_spec=pltpu.PrefetchScalarGridSpec(
            num_scalar_prefetch=0,
            grid=grid,
            in_specs=[
                pl.BlockSpec((Bt, N, C), lambda b: (b, 0, 0)),   # x batch tile
                pl.BlockSpec((C, 3 * C), lambda b: (0, 0)),      # fused QKV weight
                pl.BlockSpec((C, C), lambda b: (0, 0)),          # out-proj weight
                pl.BlockSpec((1, C), lambda b: (0, 0)),          # out-proj bias
            ],
            out_specs=[
                pl.BlockSpec((Bt, 1, N), lambda b: (b, 0, 0)),   # avg attention row 0
                pl.BlockSpec((Bt, N, C), lambda b: (b, 0, 0)),   # projected output
            ],
            scratch_shapes=[
                pltpu.VMEM((Bt * N, 3 * C), jnp.bfloat16),       # fused QKV activations
                pltpu.VMEM((Bt * N, C), jnp.bfloat16),           # head-concatenated attn@V
            ],
        ),
        compiler_params=pltpu.CompilerParams(
            dimension_semantics=("parallel",),
            vmem_limit_bytes=_vmem_limit_bytes()),
    )(x, wqkv, wproj, pb)

    # Matches PyTorch `avg_attn[:, 0, 1:]`.
    return avg_row[:, 0, 1:], out


def attention_reference(x, qkv_w, proj_w, proj_b, *, num_heads):
    """Pure-JAX reference mirroring the PyTorch forward exactly (f32)."""
    B, N, C = x.shape
    hd = C // num_heads
    scale = hd ** -0.5
    qkv = x @ qkv_w.T                                            # (B, N, 3C)
    qkv = qkv.reshape(B, N, 3, num_heads, hd).transpose(2, 0, 3, 1, 4)
    q, k, v = qkv[0], qkv[1], qkv[2]                             # (B, H, N, hd)
    attn = (q @ jnp.swapaxes(k, -2, -1)) * scale                 # (B, H, N, N)
    attn = jax.nn.softmax(attn, axis=-1)
    avg = attn.mean(axis=1)                                      # (B, N, N)
    out = (attn @ v).transpose(0, 2, 1, 3).reshape(B, N, C)
    out = out @ proj_w.T + proj_b
    return avg[:, 0, 1:], out


if __name__ == "__main__":
    B, N, C = 2, 8, 32
    num_heads = 8

    key = jax.random.PRNGKey(0)
    kx, kqkv, kpw, kpb = jax.random.split(key, 4)
    x = jax.random.normal(kx, (B, N, C), dtype=jnp.float32)
    qkv_w = jax.random.normal(kqkv, (3 * C, C), dtype=jnp.float32) * 0.05
    proj_w = jax.random.normal(kpw, (C, C), dtype=jnp.float32) * 0.05
    proj_b = jax.random.normal(kpb, (C,), dtype=jnp.float32) * 0.05

    avg_row, out = attention_forward(x, qkv_w, proj_w, proj_b, num_heads=num_heads)
    jax.block_until_ready((avg_row, out))

    ref_avg, ref_out = attention_reference(x, qkv_w, proj_w, proj_b, num_heads=num_heads)
    assert avg_row.shape == (B, N - 1) and out.shape == (B, N, C)
    # Tolerances account for bf16 MXU operands + approx-reciprocal softmax.
    assert jnp.allclose(avg_row, ref_avg, atol=1e-2, rtol=1e-2), (
        float(jnp.max(jnp.abs(avg_row - ref_avg))))
    assert jnp.allclose(out, ref_out, atol=1e-2, rtol=1e-2), (
        float(jnp.max(jnp.abs(out - ref_out))))

    print("KERNEL_OK")
</pallas_src>

<mosaic_0001>
module attributes {stable_mosaic.version = 11 : i64} {
  func.func @attention_kernel(%arg0: i32, %arg1: memref<2x8x32xf32, #tpu.memory_space<vmem>>, %arg2: memref<32x96xbf16, #tpu.memory_space<vmem>>, %arg3: memref<32x32xbf16, #tpu.memory_space<vmem>>, %arg4: memref<1x32xf32, #tpu.memory_space<vmem>>, %arg5: memref<2x1x8xf32, #tpu.memory_space<vmem>>, %arg6: memref<2x8x32xf32, #tpu.memory_space<vmem>>, %arg7: memref<16x96xbf16, #tpu.memory_space<vmem>>, %arg8: memref<16x32xbf16, #tpu.memory_space<vmem>>) attributes {dimension_semantics = [#tpu.dimension_semantics<parallel>], iteration_bounds = array<i64: 1>, scalar_prefetch = 0 : i64, scratch_operands = 2 : i64, tpu.core_type = #tpu.core_type<tc>, window_params = [{transform_indices = @transform_0, window_bounds = array<i64: 2, 8, 32>}, {pipeline_mode = #tpu.pipeline_mode<synchronous>, transform_indices = @transform_1, window_bounds = array<i64: 32, 96>}, {pipeline_mode = #tpu.pipeline_mode<synchronous>, transform_indices = @transform_2, window_bounds = array<i64: 32, 32>}, {pipeline_mode = #tpu.pipeline_mode<synchronous>, transform_indices = @transform_3, window_bounds = array<i64: 1, 32>}, {transform_indices = @transform_4, window_bounds = array<i64: 2, 1, 8>}, {transform_indices = @transform_5, window_bounds = array<i64: 2, 8, 32>}]} {
    %c0 = arith.constant 0 : index
    %c0_0 = arith.constant 0 : index
    %c0_1 = arith.constant 0 : index
    %0 = vector.load %arg1[%c0, %c0_0, %c0_1] : memref<2x8x32xf32, #tpu.memory_space<vmem>>, vector<2x8x32xf32>
    %1 = vector.shape_cast %0 : vector<2x8x32xf32> to vector<16x32xf32>
    %2 = arith.truncf %1 : vector<16x32xf32> to vector<16x32xbf16>
    %c0_2 = arith.constant 0 : index
    %c0_3 = arith.constant 0 : index
    %3 = vector.load %arg2[%c0_2, %c0_3] : memref<32x96xbf16, #tpu.memory_space<vmem>>, vector<32x96xbf16>
    %cst = arith.constant dense<0.000000e+00> : vector<16x96xf32>
    %4 = tpu.matmul %2, %3, %cst {dimension_numbers = #tpu.dot_dimension_numbers<[1], [0], [0], [1], [0, 0, 1, 1], [], []>} : vector<16x32xbf16>, vector<32x96xbf16>, vector<16x96xf32> -> vector<16x96xf32>
    %5 = arith.truncf %4 : vector<16x96xf32> to vector<16x96xbf16>
    %c0_4 = arith.constant 0 : index
    %c0_5 = arith.constant 0 : index
    %6 = vector.load %arg7[%c0_4, %c0_5] : memref<16x96xbf16, #tpu.memory_space<vmem>>, vector<16x96xbf16>
    tpu.vector_store %arg7[%c0_4, %c0_5], %5 {strides = array<i32>} : memref<16x96xbf16, #tpu.memory_space<vmem>>, vector<16x96xbf16>,
    %c0_6 = arith.constant 0 : index
    %c0_7 = arith.constant 0 : index
    %7 = vector.load %arg7[%c0_6, %c0_7] : memref<16x96xbf16, #tpu.memory_space<vmem>>, vector<16x4xbf16>
    %8 = vector.shape_cast %7 : vector<16x4xbf16> to vector<2x8x4xbf16>
    %c0_8 = arith.constant 0 : index
    %c32 = arith.constant 32 : index
    %9 = vector.load %arg7[%c0_8, %c32] : memref<16x96xbf16, #tpu.memory_space<vmem>>, vector<16x4xbf16>
    %10 = vector.shape_cast %9 : vector<16x4xbf16> to vector<2x8x4xbf16>
    %c0_9 = arith.constant 0 : index
    %c64 = arith.constant 64 : index
    %11 = vector.load %arg7[%c0_9, %c64] : memref<16x96xbf16, #tpu.memory_space<vmem>>, vector<16x4xbf16>
    %12 = vector.shape_cast %11 : vector<16x4xbf16> to vector<2x8x4xbf16>
    "tpu.trace_start"() <{level = 10 : i32, message = "bqd,bkd->bqk"}> : () -> ()
    %cst_10 = arith.constant dense<0.000000e+00> : vector<2x8x8xf32>
    %13 = tpu.matmul %8, %10, %cst_10 {dimension_numbers = #tpu.dot_dimension_numbers<[2], [2], [1], [1], [0, 0, 0, 1, 1, 1], [0], [0]>} : vector<2x8x4xbf16>, vector<2x8x4xbf16>, vector<2x8x8xf32> -> vector<2x8x8xf32>
    "tpu.trace_stop"() : () -> ()
    %cst_11 = arith.constant dense<0xFF800000> : vector<2x8xf32>
    %14 = vector.multi_reduction <maximumf>, %13, %cst_11 [2] : vector<2x8x8xf32> to vector<2x8xf32>
    %15 = vector.shape_cast %14 : vector<2x8xf32> to vector<2x8x1xf32>
    %16 = vector.broadcast %15 : vector<2x8x1xf32> to vector<2x8x8xf32>
    %17 = arith.subf %13, %16 : vector<2x8x8xf32>
    %18 = math.exp %17 : vector<2x8x8xf32>
    %cst_12 = arith.constant dense<0.000000e+00> : vector<2x8xf32>
    %19 = vector.multi_reduction <add>, %18, %cst_12 [2] : vector<2x8x8xf32> to vector<2x8xf32>
    %20 = vector.shape_cast %19 : vector<2x8xf32> to vector<2x8x1xf32>
    %21 = vector.extract_strided_slice %18 {offsets = [0, 0, 0], sizes = [2, 1, 8], strides = [1, 1, 1]} : vector<2x8x8xf32> to vector<2x1x8xf32>
    %22 = vector.extract_strided_slice %20 {offsets = [0, 0, 0], sizes = [2, 1, 1], strides = [1, 1, 1]} : vector<2x8x1xf32> to vector<2x1x1xf32>
    %23 = vector.broadcast %22 : vector<2x1x1xf32> to vector<2x1x8xf32>
    %24 = arith.divf %21, %23 : vector<2x1x8xf32>
    %25 = tpu.reciprocal %20 {approx = true} : vector<2x8x1xf32> -> vector<2x8x1xf32>
    %26 = vector.broadcast %25 : vector<2x8x1xf32> to vector<2x8x8xf32>
    %27 = arith.mulf %18, %26 : vector<2x8x8xf32>
    %28 = arith.truncf %27 : vector<2x8x8xf32> to vector<2x8x8xbf16>
    "tpu.trace_start"() <{level = 10 : i32, message = "bqk,bkd->bqd"}> : () -> ()
    %cst_13 = arith.constant dense<0.000000e+00> : vector<2x8x4xf32>
    %29 = tpu.matmul %28, %12, %cst_13 {dimension_numbers = #tpu.dot_dimension_numbers<[2], [1], [1], [2], [0, 0, 0, 1, 1, 2], [0], [0]>} : vector<2x8x8xbf16>, vector<2x8x4xbf16>, vector<2x8x4xf32> -> vector<2x8x4xf32>
    "tpu.trace_stop"() : () -> ()
    %30 = vector.shape_cast %29 : vector<2x8x4xf32> to vector<16x4xf32>
    %31 = arith.truncf %30 : vector<16x4xf32> to vector<16x4xbf16>
    %c0_14 = arith.constant 0 : index
    %c0_15 = arith.constant 0 : index
    %32 = vector.load %arg8[%c0_14, %c0_15] : memref<16x32xbf16, #tpu.memory_space<vmem>>, vector<16x4xbf16>
    tpu.vector_store %arg8[%c0_14, %c0_15], %31 {strides = array<i32>} : memref<16x32xbf16, #tpu.memory_space<vmem>>, vector<16x4xbf16>,
    %c0_16 = arith.constant 0 : index
    %c4 = arith.constant 4 : index
    %33 = vector.load %arg7[%c0_16, %c4] : memref<16x96xbf16, #tpu.memory_space<vmem>>, vector<16x4xbf16>
    %34 = vector.shape_cast %33 : vector<16x4xbf16> to vector<2x8x4xbf16>
    %c0_17 = arith.constant 0 : index
    %c36 = arith.constant 36 : index
    %35 = vector.load %arg7[%c0_17, %c36] : memref<16x96xbf16, #tpu.memory_space<vmem>>, vector<16x4xbf16>
    %36 = vector.shape_cast %35 : vector<16x4xbf16> to vector<2x8x4xbf16>
    %c0_18 = arith.constant 0 : index
    %c68 = arith.constant 68 : index
    %37 = vector.load %arg7[%c0_18, %c68] : memref<16x96xbf16, #tpu.memory_space<vmem>>, vector<16x4xbf16>
    %38 = vector.shape_cast %37 : vector<16x4xbf16> to vector<2x8x4xbf16>
    "tpu.trace_start"() <{level = 10 : i32, message = "bqd,bkd->bqk"}> : () -> ()
    %cst_19 = arith.constant dense<0.000000e+00> : vector<2x8x8xf32>
    %39 = tpu.matmul %34, %36, %cst_19 {dimension_numbers = #tpu.dot_dimension_numbers<[2], [2], [1], [1], [0, 0, 0, 1, 1, 1], [0], [0]>} : vector<2x8x4xbf16>, vector<2x8x4xbf16>, vector<2x8x8xf32> -> vector<2x8x8xf32>
    "tpu.trace_stop"() : () -> ()
    %cst_20 = arith.constant dense<0xFF800000> : vector<2x8xf32>
    %40 = vector.multi_reduction <maximumf>, %39, %cst_20 [2] : vector<2x8x8xf32> to vector<2x8xf32>
    %41 = vector.shape_cast %40 : vector<2x8xf32> to vector<2x8x1xf32>
    %42 = vector.broadcast %41 : vector<2x8x1xf32> to vector<2x8x8xf32>
    %43 = arith.subf %39, %42 : vector<2x8x8xf32>
    %44 = math.exp %43 : vector<2x8x8xf32>
    %cst_21 = arith.constant dense<0.000000e+00> : vector<2x8xf32>
    %45 = vector.multi_reduction <add>, %44, %cst_21 [2] : vector<2x8x8xf32> to vector<2x8xf32>
    %46 = vector.shape_cast %45 : vector<2x8xf32> to vector<2x8x1xf32>
    %47 = vector.extract_strided_slice %44 {offsets = [0, 0, 0], sizes = [2, 1, 8], strides = [1, 1, 1]} : vector<2x8x8xf32> to vector<2x1x8xf32>
    %48 = vector.extract_strided_slice %46 {offsets = [0, 0, 0], sizes = [2, 1, 1], strides = [1, 1, 1]} : vector<2x8x1xf32> to vector<2x1x1xf32>
    %49 = vector.broadcast %48 : vector<2x1x1xf32> to vector<2x1x8xf32>
    %50 = arith.divf %47, %49 : vector<2x1x8xf32>
    %51 = arith.addf %24, %50 : vector<2x1x8xf32>
    %52 = tpu.reciprocal %46 {approx = true} : vector<2x8x1xf32> -> vector<2x8x1xf32>
    %53 = vector.broadcast %52 : vector<2x8x1xf32> to vector<2x8x8xf32>
    %54 = arith.mulf %44, %53 : vector<2x8x8xf32>
    %55 = arith.truncf %54 : vector<2x8x8xf32> to vector<2x8x8xbf16>
    "tpu.trace_start"() <{level = 10 : i32, message = "bqk,bkd->bqd"}> : () -> ()
    %cst_22 = arith.constant dense<0.000000e+00> : vector<2x8x4xf32>
    %56 = tpu.matmul %55, %38, %cst_22 {dimension_numbers = #tpu.dot_dimension_numbers<[2], [1], [1], [2], [0, 0, 0, 1, 1, 2], [0], [0]>} : vector<2x8x8xbf16>, vector<2x8x4xbf16>, vector<2x8x4xf32> -> vector<2x8x4xf32>
    "tpu.trace_stop"() : () -> ()
    %57 = vector.shape_cast %56 : vector<2x8x4xf32> to vector<16x4xf32>
    %58 = arith.truncf %57 : vector<16x4xf32> to vector<16x4xbf16>
    %c0_23 = arith.constant 0 : index
    %c4_24 = arith.constant 4 : index
    %59 = vector.load %arg8[%c0_23, %c4_24] : memref<16x32xbf16, #tpu.memory_space<vmem>>, vector<16x4xbf16>
    tpu.vector_store %arg8[%c0_23, %c4_24], %58 {strides = array<i32>} : memref<16x32xbf16, #tpu.memory_space<vmem>>, vector<16x4xbf16>,
    %c0_25 = arith.constant 0 : index
    %c8 = arith.constant 8 : index
    %60 = vector.load %arg7[%c0_25, %c8] : memref<16x96xbf16, #tpu.memory_space<vmem>>, vector<16x4xbf16>
    %61 = vector.shape_cast %60 : vector<16x4xbf16> to vector<2x8x4xbf16>
    %c0_26 = arith.constant 0 : index
    %c40 = arith.constant 40 : index
    %62 = vector.load %arg7[%c0_26, %c40] : memref<16x96xbf16, #tpu.memory_space<vmem>>, vector<16x4xbf16>
    %63 = vector.shape_cast %62 : vector<16x4xbf16> to vector<2x8x4xbf16>
    %c0_27 = arith.constant 0 : index
    %c72 = arith.constant 72 : index
    %64 = vector.load %arg7[%c0_27, %c72] : memref<16x96xbf16, #tpu.memory_space<vmem>>, vector<16x4xbf16>
    %65 = vector.shape_cast %64 : vector<16x4xbf16> to vector<2x8x4xbf16>
    "tpu.trace_start"() <{level = 10 : i32, message = "bqd,bkd->bqk"}> : () -> ()
    %cst_28 = arith.constant dense<0.000000e+00> : vector<2x8x8xf32>
    %66 = tpu.matmul %61, %63, %cst_28 {dimension_numbers = #tpu.dot_dimension_numbers<[2], [2], [1], [1], [0, 0, 0, 1, 1, 1], [0], [0]>} : vector<2x8x4xbf16>, vector<2x8x4xbf16>, vector<2x8x8xf32> -> vector<2x8x8xf32>
    "tpu.trace_stop"() : () -> ()
    %cst_29 = arith.constant dense<0xFF800000> : vector<2x8xf32>
    %67 = vector.multi_reduction <maximumf>, %66, %cst_29 [2] : vector<2x8x8xf32> to vector<2x8xf32>
    %68 = vector.shape_cast %67 : vector<2x8xf32> to vector<2x8x1xf32>
    %69 = vector.broadcast %68 : vector<2x8x1xf32> to vector<2x8x8xf32>
    %70 = arith.subf %66, %69 : vector<2x8x8xf32>
    %71 = math.exp %70 : vector<2x8x8xf32>
    %cst_30 = arith.constant dense<0.000000e+00> : vector<2x8xf32>
    %72 = vector.multi_reduction <add>, %71, %cst_30 [2] : vector<2x8x8xf32> to vector<2x8xf32>
    %73 = vector.shape_cast %72 : vector<2x8xf32> to vector<2x8x1xf32>
    %74 = vector.extract_strided_slice %71 {offsets = [0, 0, 0], sizes = [2, 1, 8], strides = [1, 1, 1]} : vector<2x8x8xf32> to vector<2x1x8xf32>
    %75 = vector.extract_strided_slice %73 {offsets = [0, 0, 0], sizes = [2, 1, 1], strides = [1, 1, 1]} : vector<2x8x1xf32> to vector<2x1x1xf32>
    %76 = vector.broadcast %75 : vector<2x1x1xf32> to vector<2x1x8xf32>
    %77 = arith.divf %74, %76 : vector<2x1x8xf32>
    %78 = arith.addf %51, %77 : vector<2x1x8xf32>
    %79 = tpu.reciprocal %73 {approx = true} : vector<2x8x1xf32> -> vector<2x8x1xf32>
    %80 = vector.broadcast %79 : vector<2x8x1xf32> to vector<2x8x8xf32>
    %81 = arith.mulf %71, %80 : vector<2x8x8xf32>
    %82 = arith.truncf %81 : vector<2x8x8xf32> to vector<2x8x8xbf16>
    "tpu.trace_start"() <{level = 10 : i32, message = "bqk,bkd->bqd"}> : () -> ()
    %cst_31 = arith.constant dense<0.000000e+00> : vector<2x8x4xf32>
    %83 = tpu.matmul %82, %65, %cst_31 {dimension_numbers = #tpu.dot_dimension_numbers<[2], [1], [1], [2], [0, 0, 0, 1, 1, 2], [0], [0]>} : vector<2x8x8xbf16>, vector<2x8x4xbf16>, vector<2x8x4xf32> -> vector<2x8x4xf32>
    "tpu.trace_stop"() : () -> ()
    %84 = vector.shape_cast %83 : vector<2x8x4xf32> to vector<16x4xf32>
    %85 = arith.truncf %84 : vector<16x4xf32> to vector<16x4xbf16>
    %c0_32 = arith.constant 0 : index
    %c8_33 = arith.constant 8 : index
    %86 = vector.load %arg8[%c0_32, %c8_33] : memref<16x32xbf16, #tpu.memory_space<vmem>>, vector<16x4xbf16>
    tpu.vector_store %arg8[%c0_32, %c8_33], %85 {strides = array<i32>} : memref<16x32xbf16, #tpu.memory_space<vmem>>, vector<16x4xbf16>,
    %c0_34 = arith.constant 0 : index
    %c12 = arith.constant 12 : index
    %87 = vector.load %arg7[%c0_34, %c12] : memref<16x96xbf16, #tpu.memory_space<vmem>>, vector<16x4xbf16>
    %88 = vector.shape_cast %87 : vector<16x4xbf16> to vector<2x8x4xbf16>
    %c0_35 = arith.constant 0 : index
    %c44 = arith.constant 44 : index
    %89 = vector.load %arg7[%c0_35, %c44] : memref<16x96xbf16, #tpu.memory_space<vmem>>, vector<16x4xbf16>
    %90 = vector.shape_cast %89 : vector<16x4xbf16> to vector<2x8x4xbf16>
    %c0_36 = arith.constant 0 : index
    %c76 = arith.constant 76 : index
    %91 = vector.load %arg7[%c0_36, %c76] : memref<16x96xbf16, #tpu.memory_space<vmem>>, vector<16x4xbf16>
    %92 = vector.shape_cast %91 : vector<16x4xbf16> to vector<2x8x4xbf16>
    "tpu.trace_start"() <{level = 10 : i32, message = "bqd,bkd->bqk"}> : () -> ()
    %cst_37 = arith.constant dense<0.000000e+00> : vector<2x8x8xf32>
    %93 = tpu.matmul %88, %90, %cst_37 {dimension_numbers = #tpu.dot_dimension_numbers<[2], [2], [1], [1], [0, 0, 0, 1, 1, 1], [0], [0]>} : vector<2x8x4xbf16>, vector<2x8x4xbf16>, vector<2x8x8xf32> -> vector<2x8x8xf32>
    "tpu.trace_stop"() : () -> ()
    %cst_38 = arith.constant dense<0xFF800000> : vector<2x8xf32>
    %94 = vector.multi_reduction <maximumf>, %93, %cst_38 [2] : vector<2x8x8xf32> to vector<2x8xf32>
    %95 = vector.shape_cast %94 : vector<2x8xf32> to vector<2x8x1xf32>
    %96 = vector.broadcast %95 : vector<2x8x1xf32> to vector<2x8x8xf32>
    %97 = arith.subf %93, %96 : vector<2x8x8xf32>
    %98 = math.exp %97 : vector<2x8x8xf32>
    %cst_39 = arith.constant dense<0.000000e+00> : vector<2x8xf32>
    %99 = vector.multi_reduction <add>, %98, %cst_39 [2] : vector<2x8x8xf32> to vector<2x8xf32>
    %100 = vector.shape_cast %99 : vector<2x8xf32> to vector<2x8x1xf32>
    %101 = vector.extract_strided_slice %98 {offsets = [0, 0, 0], sizes = [2, 1, 8], strides = [1, 1, 1]} : vector<2x8x8xf32> to vector<2x1x8xf32>
    %102 = vector.extract_strided_slice %100 {offsets = [0, 0, 0], sizes = [2, 1, 1], strides = [1, 1, 1]} : vector<2x8x1xf32> to vector<2x1x1xf32>
    %103 = vector.broadcast %102 : vector<2x1x1xf32> to vector<2x1x8xf32>
    %104 = arith.divf %101, %103 : vector<2x1x8xf32>
    %105 = arith.addf %78, %104 : vector<2x1x8xf32>
    %106 = tpu.reciprocal %100 {approx = true} : vector<2x8x1xf32> -> vector<2x8x1xf32>
    %107 = vector.broadcast %106 : vector<2x8x1xf32> to vector<2x8x8xf32>
    %108 = arith.mulf %98, %107 : vector<2x8x8xf32>
    %109 = arith.truncf %108 : vector<2x8x8xf32> to vector<2x8x8xbf16>
    "tpu.trace_start"() <{level = 10 : i32, message = "bqk,bkd->bqd"}> : () -> ()
    %cst_40 = arith.constant dense<0.000000e+00> : vector<2x8x4xf32>
    %110 = tpu.matmul %109, %92, %cst_40 {dimension_numbers = #tpu.dot_dimension_numbers<[2], [1], [1], [2], [0, 0, 0, 1, 1, 2], [0], [0]>} : vector<2x8x8xbf16>, vector<2x8x4xbf16>, vector<2x8x4xf32> -> vector<2x8x4xf32>
    "tpu.trace_stop"() : () -> ()
    %111 = vector.shape_cast %110 : vector<2x8x4xf32> to vector<16x4xf32>
    %112 = arith.truncf %111 : vector<16x4xf32> to vector<16x4xbf16>
    %c0_41 = arith.constant 0 : index
    %c12_42 = arith.constant 12 : index
    %113 = vector.load %arg8[%c0_41, %c12_42] : memref<16x32xbf16, #tpu.memory_space<vmem>>, vector<16x4xbf16>
    tpu.vector_store %arg8[%c0_41, %c12_42], %112 {strides = array<i32>} : memref<16x32xbf16, #tpu.memory_space<vmem>>, vector<16x4xbf16>,
    %c0_43 = arith.constant 0 : index
    %c16 = arith.constant 16 : index
    %114 = vector.load %arg7[%c0_43, %c16] : memref<16x96xbf16, #tpu.memory_space<vmem>>, vector<16x4xbf16>
    %115 = vector.shape_cast %114 : vector<16x4xbf16> to vector<2x8x4xbf16>
    %c0_44 = arith.constant 0 : index
    %c48 = arith.constant 48 : index
    %116 = vector.load %arg7[%c0_44, %c48] : memref<16x96xbf16, #tpu.memory_space<vmem>>, vector<16x4xbf16>
    %117 = vector.shape_cast %116 : vector<16x4xbf16> to vector<2x8x4xbf16>
    %c0_45 = arith.constant 0 : index
    %c80 = arith.constant 80 : index
    %118 = vector.load %arg7[%c0_45, %c80] : memref<16x96xbf16, #tpu.memory_space<vmem>>, vector<16x4xbf16>
    %119 = vector.shape_cast %118 : vector<16x4xbf16> to vector<2x8x4xbf16>
    "tpu.trace_start"() <{level = 10 : i32, message = "bqd,bkd->bqk"}> : () -> ()
    %cst_46 = arith.constant dense<0.000000e+00> : vector<2x8x8xf32>
    %120 = tpu.matmul %115, %117, %cst_46 {dimension_numbers = #tpu.dot_dimension_numbers<[2], [2], [1], [1], [0, 0, 0, 1, 1, 1], [0], [0]>} : vector<2x8x4xbf16>, vector<2x8x4xbf16>, vector<2x8x8xf32> -> vector<2x8x8xf32>
    "tpu.trace_stop"() : () -> ()
    %cst_47 = arith.constant dense<0xFF800000> : vector<2x8xf32>
    %121 = vector.multi_reduction <maximumf>, %120, %cst_47 [2] : vector<2x8x8xf32> to vector<2x8xf32>
    %122 = vector.shape_cast %121 : vector<2x8xf32> to vector<2x8x1xf32>
    %123 = vector.broadcast %122 : vector<2x8x1xf32> to vector<2x8x8xf32>
    %124 = arith.subf %120, %123 : vector<2x8x8xf32>
    %125 = math.exp %124 : vector<2x8x8xf32>
    %cst_48 = arith.constant dense<0.000000e+00> : vector<2x8xf32>
    %126 = vector.multi_reduction <add>, %125, %cst_48 [2] : vector<2x8x8xf32> to vector<2x8xf32>
    %127 = vector.shape_cast %126 : vector<2x8xf32> to vector<2x8x1xf32>
    %128 = vector.extract_strided_slice %125 {offsets = [0, 0, 0], sizes = [2, 1, 8], strides = [1, 1, 1]} : vector<2x8x8xf32> to vector<2x1x8xf32>
    %129 = vector.extract_strided_slice %127 {offsets = [0, 0, 0], sizes = [2, 1, 1], strides = [1, 1, 1]} : vector<2x8x1xf32> to vector<2x1x1xf32>
    %130 = vector.broadcast %129 : vector<2x1x1xf32> to vector<2x1x8xf32>
    %131 = arith.divf %128, %130 : vector<2x1x8xf32>
    %132 = arith.addf %105, %131 : vector<2x1x8xf32>
    %133 = tpu.reciprocal %127 {approx = true} : vector<2x8x1xf32> -> vector<2x8x1xf32>
    %134 = vector.broadcast %133 : vector<2x8x1xf32> to vector<2x8x8xf32>
    %135 = arith.mulf %125, %134 : vector<2x8x8xf32>
    %136 = arith.truncf %135 : vector<2x8x8xf32> to vector<2x8x8xbf16>
    "tpu.trace_start"() <{level = 10 : i32, message = "bqk,bkd->bqd"}> : () -> ()
    %cst_49 = arith.constant dense<0.000000e+00> : vector<2x8x4xf32>
    %137 = tpu.matmul %136, %119, %cst_49 {dimension_numbers = #tpu.dot_dimension_numbers<[2], [1], [1], [2], [0, 0, 0, 1, 1, 2], [0], [0]>} : vector<2x8x8xbf16>, vector<2x8x4xbf16>, vector<2x8x4xf32> -> vector<2x8x4xf32>
    "tpu.trace_stop"() : () -> ()
    %138 = vector.shape_cast %137 : vector<2x8x4xf32> to vector<16x4xf32>
    %139 = arith.truncf %138 : vector<16x4xf32> to vector<16x4xbf16>
    %c0_50 = arith.constant 0 : index
    %c16_51 = arith.constant 16 : index
    %140 = vector.load %arg8[%c0_50, %c16_51] : memref<16x32xbf16, #tpu.memory_space<vmem>>, vector<16x4xbf16>
    tpu.vector_store %arg8[%c0_50, %c16_51], %139 {strides = array<i32>} : memref<16x32xbf16, #tpu.memory_space<vmem>>, vector<16x4xbf16>,
    %c0_52 = arith.constant 0 : index
    %c20 = arith.constant 20 : index
    %141 = vector.load %arg7[%c0_52, %c20] : memref<16x96xbf16, #tpu.memory_space<vmem>>, vector<16x4xbf16>
    %142 = vector.shape_cast %141 : vector<16x4xbf16> to vector<2x8x4xbf16>
    %c0_53 = arith.constant 0 : index
    %c52 = arith.constant 52 : index
    %143 = vector.load %arg7[%c0_53, %c52] : memref<16x96xbf16, #tpu.memory_space<vmem>>, vector<16x4xbf16>
    %144 = vector.shape_cast %143 : vector<16x4xbf16> to vector<2x8x4xbf16>
    %c0_54 = arith.constant 0 : index
    %c84 = arith.constant 84 : index
    %145 = vector.load %arg7[%c0_54, %c84] : memref<16x96xbf16, #tpu.memory_space<vmem>>, vector<16x4xbf16>
    %146 = vector.shape_cast %145 : vector<16x4xbf16> to vector<2x8x4xbf16>
    "tpu.trace_start"() <{level = 10 : i32, message = "bqd,bkd->bqk"}> : () -> ()
    %cst_55 = arith.constant dense<0.000000e+00> : vector<2x8x8xf32>
    %147 = tpu.matmul %142, %144, %cst_55 {dimension_numbers = #tpu.dot_dimension_numbers<[2], [2], [1], [1], [0, 0, 0, 1, 1, 1], [0], [0]>} : vector<2x8x4xbf16>, vector<2x8x4xbf16>, vector<2x8x8xf32> -> vector<2x8x8xf32>
    "tpu.trace_stop"() : () -> ()
    %cst_56 = arith.constant dense<0xFF800000> : vector<2x8xf32>
    %148 = vector.multi_reduction <maximumf>, %147, %cst_56 [2] : vector<2x8x8xf32> to vector<2x8xf32>
    %149 = vector.shape_cast %148 : vector<2x8xf32> to vector<2x8x1xf32>
    %150 = vector.broadcast %149 : vector<2x8x1xf32> to vector<2x8x8xf32>
    %151 = arith.subf %147, %150 : vector<2x8x8xf32>
    %152 = math.exp %151 : vector<2x8x8xf32>
    %cst_57 = arith.constant dense<0.000000e+00> : vector<2x8xf32>
    %153 = vector.multi_reduction <add>, %152, %cst_57 [2] : vector<2x8x8xf32> to vector<2x8xf32>
    %154 = vector.shape_cast %153 : vector<2x8xf32> to vector<2x8x1xf32>
    %155 = vector.extract_strided_slice %152 {offsets = [0, 0, 0], sizes = [2, 1, 8], strides = [1, 1, 1]} : vector<2x8x8xf32> to vector<2x1x8xf32>
    %156 = vector.extract_strided_slice %154 {offsets = [0, 0, 0], sizes = [2, 1, 1], strides = [1, 1, 1]} : vector<2x8x1xf32> to vector<2x1x1xf32>
    %157 = vector.broadcast %156 : vector<2x1x1xf32> to vector<2x1x8xf32>
    %158 = arith.divf %155, %157 : vector<2x1x8xf32>
    %159 = arith.addf %132, %158 : vector<2x1x8xf32>
    %160 = tpu.reciprocal %154 {approx = true} : vector<2x8x1xf32> -> vector<2x8x1xf32>
    %161 = vector.broadcast %160 : vector<2x8x1xf32> to vector<2x8x8xf32>
    %162 = arith.mulf %152, %161 : vector<2x8x8xf32>
    %163 = arith.truncf %162 : vector<2x8x8xf32> to vector<2x8x8xbf16>
    "tpu.trace_start"() <{level = 10 : i32, message = "bqk,bkd->bqd"}> : () -> ()
    %cst_58 = arith.constant dense<0.000000e+00> : vector<2x8x4xf32>
    %164 = tpu.matmul %163, %146, %cst_58 {dimension_numbers = #tpu.dot_dimension_numbers<[2], [1], [1], [2], [0, 0, 0, 1, 1, 2], [0], [0]>} : vector<2x8x8xbf16>, vector<2x8x4xbf16>, vector<2x8x4xf32> -> vector<2x8x4xf32>
    "tpu.trace_stop"() : () -> ()
    %165 = vector.shape_cast %164 : vector<2x8x4xf32> to vector<16x4xf32>
    %166 = arith.truncf %165 : vector<16x4xf32> to vector<16x4xbf16>
    %c0_59 = arith.constant 0 : index
    %c20_60 = arith.constant 20 : index
    %167 = vector.load %arg8[%c0_59, %c20_60] : memref<16x32xbf16, #tpu.memory_space<vmem>>, vector<16x4xbf16>
    tpu.vector_store %arg8[%c0_59, %c20_60], %166 {strides = array<i32>} : memref<16x32xbf16, #tpu.memory_space<vmem>>, vector<16x4xbf16>,
    %c0_61 = arith.constant 0 : index
    %c24 = arith.constant 24 : index
    %168 = vector.load %arg7[%c0_61, %c24] : memref<16x96xbf16, #tpu.memory_space<vmem>>, vector<16x4xbf16>
    %169 = vector.shape_cast %168 : vector<16x4xbf16> to vector<2x8x4xbf16>
    %c0_62 = arith.constant 0 : index
    %c56 = arith.constant 56 : index
    %170 = vector.load %arg7[%c0_62, %c56] : memref<16x96xbf16, #tpu.memory_space<vmem>>, vector<16x4xbf16>
    %171 = vector.shape_cast %170 : vector<16x4xbf16> to vector<2x8x4xbf16>
    %c0_63 = arith.constant 0 : index
    %c88 = arith.constant 88 : index
    %172 = vector.load %arg7[%c0_63, %c88] : memref<16x96xbf16, #tpu.memory_space<vmem>>, vector<16x4xbf16>
    %173 = vector.shape_cast %172 : vector<16x4xbf16> to vector<2x8x4xbf16>
    "tpu.trace_start"() <{level = 10 : i32, message = "bqd,bkd->bqk"}> : () -> ()
    %cst_64 = arith.constant dense<0.000000e+00> : vector<2x8x8xf32>
    %174 = tpu.matmul %169, %171, %cst_64 {dimension_numbers = #tpu.dot_dimension_numbers<[2], [2], [1], [1], [0, 0, 0, 1, 1, 1], [0], [0]>} : vector<2x8x4xbf16>, vector<2x8x4xbf16>, vector<2x8x8xf32> -> vector<2x8x8xf32>
    "tpu.trace_stop"() : () -> ()
    %cst_65 = arith.constant dense<0xFF800000> : vector<2x8xf32>
    %175 = vector.multi_reduction <maximumf>, %174, %cst_65 [2] : vector<2x8x8xf32> to vector<2x8xf32>
    %176 = vector.shape_cast %175 : vector<2x8xf32> to vector<2x8x1xf32>
    %177 = vector.broadcast %176 : vector<2x8x1xf32> to vector<2x8x8xf32>
    %178 = arith.subf %174, %177 : vector<2x8x8xf32>
    %179 = math.exp %178 : vector<2x8x8xf32>
    %cst_66 = arith.constant dense<0.000000e+00> : vector<2x8xf32>
    %180 = vector.multi_reduction <add>, %179, %cst_66 [2] : vector<2x8x8xf32> to vector<2x8xf32>
    %181 = vector.shape_cast %180 : vector<2x8xf32> to vector<2x8x1xf32>
    %182 = vector.extract_strided_slice %179 {offsets = [0, 0, 0], sizes = [2, 1, 8], strides = [1, 1, 1]} : vector<2x8x8xf32> to vector<2x1x8xf32>
    %183 = vector.extract_strided_slice %181 {offsets = [0, 0, 0], sizes = [2, 1, 1], strides = [1, 1, 1]} : vector<2x8x1xf32> to vector<2x1x1xf32>
    %184 = vector.broadcast %183 : vector<2x1x1xf32> to vector<2x1x8xf32>
    %185 = arith.divf %182, %184 : vector<2x1x8xf32>
    %186 = arith.addf %159, %185 : vector<2x1x8xf32>
    %187 = tpu.reciprocal %181 {approx = true} : vector<2x8x1xf32> -> vector<2x8x1xf32>
    %188 = vector.broadcast %187 : vector<2x8x1xf32> to vector<2x8x8xf32>
    %189 = arith.mulf %179, %188 : vector<2x8x8xf32>
    %190 = arith.truncf %189 : vector<2x8x8xf32> to vector<2x8x8xbf16>
    "tpu.trace_start"() <{level = 10 : i32, message = "bqk,bkd->bqd"}> : () -> ()
    %cst_67 = arith.constant dense<0.000000e+00> : vector<2x8x4xf32>
    %191 = tpu.matmul %190, %173, %cst_67 {dimension_numbers = #tpu.dot_dimension_numbers<[2], [1], [1], [2], [0, 0, 0, 1, 1, 2], [0], [0]>} : vector<2x8x8xbf16>, vector<2x8x4xbf16>, vector<2x8x4xf32> -> vector<2x8x4xf32>
    "tpu.trace_stop"() : () -> ()
    %192 = vector.shape_cast %191 : vector<2x8x4xf32> to vector<16x4xf32>
    %193 = arith.truncf %192 : vector<16x4xf32> to vector<16x4xbf16>
    %c0_68 = arith.constant 0 : index
    %c24_69 = arith.constant 24 : index
    %194 = vector.load %arg8[%c0_68, %c24_69] : memref<16x32xbf16, #tpu.memory_space<vmem>>, vector<16x4xbf16>
    tpu.vector_store %arg8[%c0_68, %c24_69], %193 {strides = array<i32>} : memref<16x32xbf16, #tpu.memory_space<vmem>>, vector<16x4xbf16>,
    %c0_70 = arith.constant 0 : index
    %c28 = arith.constant 28 : index
    %195 = vector.load %arg7[%c0_70, %c28] : memref<16x96xbf16, #tpu.memory_space<vmem>>, vector<16x4xbf16>
    %196 = vector.shape_cast %195 : vector<16x4xbf16> to vector<2x8x4xbf16>
    %c0_71 = arith.constant 0 : index
    %c60 = arith.constant 60 : index
    %197 = vector.load %arg7[%c0_71, %c60] : memref<16x96xbf16, #tpu.memory_space<vmem>>, vector<16x4xbf16>
    %198 = vector.shape_cast %197 : vector<16x4xbf16> to vector<2x8x4xbf16>
    %c0_72 = arith.constant 0 : index
    %c92 = arith.constant 92 : index
    %199 = vector.load %arg7[%c0_72, %c92] : memref<16x96xbf16, #tpu.memory_space<vmem>>, vector<16x4xbf16>
    %200 = vector.shape_cast %199 : vector<16x4xbf16> to vector<2x8x4xbf16>
    "tpu.trace_start"() <{level = 10 : i32, message = "bqd,bkd->bqk"}> : () -> ()
    %cst_73 = arith.constant dense<0.000000e+00> : vector<2x8x8xf32>
    %201 = tpu.matmul %196, %198, %cst_73 {dimension_numbers = #tpu.dot_dimension_numbers<[2], [2], [1], [1], [0, 0, 0, 1, 1, 1], [0], [0]>} : vector<2x8x4xbf16>, vector<2x8x4xbf16>, vector<2x8x8xf32> -> vector<2x8x8xf32>
    "tpu.trace_stop"() : () -> ()
    %cst_74 = arith.constant dense<0xFF800000> : vector<2x8xf32>
    %202 = vector.multi_reduction <maximumf>, %201, %cst_74 [2] : vector<2x8x8xf32> to vector<2x8xf32>
    %203 = vector.shape_cast %202 : vector<2x8xf32> to vector<2x8x1xf32>
    %204 = vector.broadcast %203 : vector<2x8x1xf32> to vector<2x8x8xf32>
    %205 = arith.subf %201, %204 : vector<2x8x8xf32>
    %206 = math.exp %205 : vector<2x8x8xf32>
    %cst_75 = arith.constant dense<0.000000e+00> : vector<2x8xf32>
    %207 = vector.multi_reduction <add>, %206, %cst_75 [2] : vector<2x8x8xf32> to vector<2x8xf32>
    %208 = vector.shape_cast %207 : vector<2x8xf32> to vector<2x8x1xf32>
    %209 = vector.extract_strided_slice %206 {offsets = [0, 0, 0], sizes = [2, 1, 8], strides = [1, 1, 1]} : vector<2x8x8xf32> to vector<2x1x8xf32>
    %210 = vector.extract_strided_slice %208 {offsets = [0, 0, 0], sizes = [2, 1, 1], strides = [1, 1, 1]} : vector<2x8x1xf32> to vector<2x1x1xf32>
    %211 = vector.broadcast %210 : vector<2x1x1xf32> to vector<2x1x8xf32>
    %212 = arith.divf %209, %211 : vector<2x1x8xf32>
    %213 = arith.addf %186, %212 : vector<2x1x8xf32>
    %214 = tpu.reciprocal %208 {approx = true} : vector<2x8x1xf32> -> vector<2x8x1xf32>
    %215 = vector.broadcast %214 : vector<2x8x1xf32> to vector<2x8x8xf32>
    %216 = arith.mulf %206, %215 : vector<2x8x8xf32>
    %217 = arith.truncf %216 : vector<2x8x8xf32> to vector<2x8x8xbf16>
    "tpu.trace_start"() <{level = 10 : i32, message = "bqk,bkd->bqd"}> : () -> ()
    %cst_76 = arith.constant dense<0.000000e+00> : vector<2x8x4xf32>
    %218 = tpu.matmul %217, %200, %cst_76 {dimension_numbers = #tpu.dot_dimension_numbers<[2], [1], [1], [2], [0, 0, 0, 1, 1, 2], [0], [0]>} : vector<2x8x8xbf16>, vector<2x8x4xbf16>, vector<2x8x4xf32> -> vector<2x8x4xf32>
    "tpu.trace_stop"() : () -> ()
    %219 = vector.shape_cast %218 : vector<2x8x4xf32> to vector<16x4xf32>
    %220 = arith.truncf %219 : vector<16x4xf32> to vector<16x4xbf16>
    %c0_77 = arith.constant 0 : index
    %c28_78 = arith.constant 28 : index
    %221 = vector.load %arg8[%c0_77, %c28_78] : memref<16x32xbf16, #tpu.memory_space<vmem>>, vector<16x4xbf16>
    tpu.vector_store %arg8[%c0_77, %c28_78], %220 {strides = array<i32>} : memref<16x32xbf16, #tpu.memory_space<vmem>>, vector<16x4xbf16>,
    %cst_79 = arith.constant 1.250000e-01 : f32
    %222 = vector.broadcast %cst_79 : f32 to vector<2x1x8xf32>
    %223 = arith.mulf %213, %222 : vector<2x1x8xf32>
    %c0_80 = arith.constant 0 : index
    %c0_81 = arith.constant 0 : index
    %c0_82 = arith.constant 0 : index
    %224 = vector.load %arg5[%c0_80, %c0_81, %c0_82] : memref<2x1x8xf32, #tpu.memory_space<vmem>>, vector<2x1x8xf32>
    tpu.vector_store %arg5[%c0_80, %c0_81, %c0_82], %223 {strides = array<i32>} : memref<2x1x8xf32, #tpu.memory_space<vmem>>, vector<2x1x8xf32>,
    %c0_83 = arith.constant 0 : index
    %c0_84 = arith.constant 0 : index
    %225 = vector.load %arg8[%c0_83, %c0_84] : memref<16x32xbf16, #tpu.memory_space<vmem>>, vector<16x32xbf16>
    %c0_85 = arith.constant 0 : index
    %c0_86 = arith.constant 0 : index
    %226 = vector.load %arg3[%c0_85, %c0_86] : memref<32x32xbf16, #tpu.memory_space<vmem>>, vector<32x32xbf16>
    %cst_87 = arith.constant dense<0.000000e+00> : vector<16x32xf32>
    %227 = tpu.matmul %225, %226, %cst_87 {dimension_numbers = #tpu.dot_dimension_numbers<[1], [0], [0], [1], [0, 0, 1, 1], [], []>} : vector<16x32xbf16>, vector<32x32xbf16>, vector<16x32xf32> -> vector<16x32xf32>
    %c0_88 = arith.constant 0 : index
    %c0_89 = arith.constant 0 : index
    %228 = vector.load %arg4[%c0_88, %c0_89] : memref<1x32xf32, #tpu.memory_space<vmem>>, vector<1x32xf32>
    %229 = vector.broadcast %228 : vector<1x32xf32> to vector<16x32xf32>
    %230 = arith.addf %227, %229 : vector<16x32xf32>
    %231 = vector.shape_cast %230 : vector<16x32xf32> to vector<2x8x32xf32>
    %c0_90 = arith.constant 0 : index
    %c0_91 = arith.constant 0 : index
    %c0_92 = arith.constant 0 : index
    %232 = vector.load %arg6[%c0_90, %c0_91, %c0_92] : memref<2x8x32xf32, #tpu.memory_space<vmem>>, vector<2x8x32xf32>
    tpu.vector_store %arg6[%c0_90, %c0_91, %c0_92], %231 {strides = array<i32>} : memref<2x8x32xf32, #tpu.memory_space<vmem>>, vector<2x8x32xf32>,
    return
  }
  func.func @transform_0(%arg0: i32) -> (i32, i32, i32) {
    %c0_i32 = arith.constant 0 : i32
    %c0_i32_0 = arith.constant 0 : i32
    %c0_i32_1 = arith.constant 0 : i32
    return %arg0, %c0_i32, %c0_i32_0 : i32, i32, i32
  }
  func.func @transform_1(%arg0: i32) -> (i32, i32) {
    %c0_i32 = arith.constant 0 : i32
    %c0_i32_0 = arith.constant 0 : i32
    %c0_i32_1 = arith.constant 0 : i32
    return %c0_i32, %c0_i32_0 : i32, i32
  }
  func.func @transform_2(%arg0: i32) -> (i32, i32) {
    %c0_i32 = arith.constant 0 : i32
    %c0_i32_0 = arith.constant 0 : i32
    %c0_i32_1 = arith.constant 0 : i32
    return %c0_i32, %c0_i32_0 : i32, i32
  }
  func.func @transform_3(%arg0: i32) -> (i32, i32) {
    %c0_i32 = arith.constant 0 : i32
    %c0_i32_0 = arith.constant 0 : i32
    %c0_i32_1 = arith.constant 0 : i32
    return %c0_i32, %c0_i32_0 : i32, i32
  }
  func.func @transform_4(%arg0: i32) -> (i32, i32, i32) {
    %c0_i32 = arith.constant 0 : i32
    %c0_i32_0 = arith.constant 0 : i32
    %c0_i32_1 = arith.constant 0 : i32
    return %arg0, %c0_i32, %c0_i32_0 : i32, i32, i32
  }
  func.func @transform_5(%arg0: i32) -> (i32, i32, i32) {
    %c0_i32 = arith.constant 0 : i32
    %c0_i32_0 = arith.constant 0 : i32
    %c0_i32_1 = arith.constant 0 : i32
    return %arg0, %c0_i32, %c0_i32_0 : i32, i32, i32
  }
}

</mosaic_0001>

<bundles_post_ra>
// kernel: tpu_custom_call.1
= control target key start
LH: loop header
LB: loop body
LE: loop exit
PB: predicated region body
PF: predicated region fallthrough
CT: control target
= control target key end

     0   :  { %11 = vsyncpa [#allocation5], 0  ;;  %s3330_s0 = inlined_call_operand.hbm [shape: f32[2,8,32], index: 0, kind: input, shape index: {}]   ;;  %s3331_s1 = inlined_call_operand.hbm [shape: bf16[32,96], index: 1, kind: input, shape index: {}]   ;;  %s3332_s2 = inlined_call_operand.hbm [shape: bf16[32,32], index: 2, kind: input, shape index: {}]   ;;  %s3333_s3 = inlined_call_operand.vmem [shape: f32[1,32], index: 3, kind: input, shape index: {}]   ;;  %s3334_s4 = inlined_call_operand.hbm [shape: f32[2,1,8], index: 4, kind: output, shape index: {0}]   ;;  %s3335_s5 = inlined_call_operand.hbm [shape: f32[2,8,32], index: 5, kind: output, shape index: {1}]  }
   0x1   :  { %12 = vsyncpa [#allocation8], 0 }
   0x2   :  { %13 = vsyncpa [#allocation6], 0 }
   0x3   :  { %14 = vsyncpa [#allocation12], 0  ;;  %s2840_s18 = smov [#allocation7]  }
   0x4   :  { %s32_s19 = sshll.u32 %s2840_s18, 4  ;;  %s33_s19 = int_to_ptr.vmem [resolvable:$true] %s32_s19 }
   0x5   :  { %s2740_s20 = scalar_lea.vmem %s33_s19, 256  ;;  %p2745_p1 = scmp.lt.s32.totalorder %s33_s19, %s33_s19 }
   0x6   :  { %p2741_p0 = scmp.ne.s32.totalorder %s33_s19, %s2740_s20  ;;  %p2746_p2 = scmp.lt.s32.totalorder %s2740_s20, %s2740_s20 }
   0x8   :  { %p2747_p3 = por %p2746_p2, %p2745_p1 }
   0xa   :  { %p2748_p4 = pnand %p2747_p3, %p2741_p0 }
   0xc   :  { %2751 = shalt.err (!%p2748_p4)
}
   0xd   :  { %s2841_s21 = smov 64   ;;  %s2842_s22 = smov 4  }
   0xe   :  { %38 = dma.hbm_to_vmem [thread:$0]  %s3331_s1, 256, %s33_s19, [#allocation8], %s2841_s21, %s2841_s21, %s2842_s22  }
   0xf   :  { %s2843_s25 = smov [#allocation4]  }
  0x10   :  { %s20_s26 = sshll.u32 %s2843_s25, 4  ;;  %s21_s26 = int_to_ptr.vmem [resolvable:$true] %s20_s26 }
  0x11   :  { %s2760_s27 = scalar_lea.vmem %s21_s26, 256  ;;  %p2765_p6 = scmp.lt.s32.totalorder %s21_s26, %s21_s26 }
  0x12   :  { %p2761_p5 = scmp.ne.s32.totalorder %s21_s26, %s2760_s27  ;;  %p2766_p7 = scmp.lt.s32.totalorder %s2760_s27, %s2760_s27 }
  0x14   :  { %p2767_p8 = por %p2766_p7, %p2765_p6 }
  0x16   :  { %p2768_p9 = pnand %p2767_p8, %p2761_p5 }
  0x18   :  { %2771 = shalt.err (!%p2768_p9)
}
  0x19   :  { %s2844_s28 = smov 128   ;;  %s2845_s29 = smov 8  }
  0x1a   :  { %26 = dma.hbm_to_vmem [thread:$0]  %s3330_s0, 256, %s21_s26, [#allocation5], %s2844_s28, %s2844_s28, %s2845_s29  }
  0x1b   :  { %s2846_s1 = smov [#allocation9]  }
  0x1c   :  { %s44_s7 = sshll.u32 %s2846_s1, 4  ;;  %s45_s7 = int_to_ptr.vmem [resolvable:$true] %s44_s7 }
  0x1d   :  { %s2780_s8 = scalar_lea.vmem %s45_s7, 256  ;;  %p2785_p11 = scmp.lt.s32.totalorder %s45_s7, %s45_s7 }
  0x1e   :  { %p2781_p10 = scmp.ne.s32.totalorder %s45_s7, %s2780_s8  ;;  %p2786_p12 = scmp.lt.s32.totalorder %s2780_s8, %s2780_s8 }
  0x20   :  { %p2787_p13 = por %p2786_p12, %p2785_p11 }
  0x22   :  { %p2788_p0 = pnand %p2787_p13, %p2781_p10 }
  0x24   :  { %2791 = shalt.err (!%p2788_p0)
}
  0x25   :  { %50 = dma.hbm_to_vmem [thread:$0]  %s3332_s2, 256, %s45_s7, [#allocation8], %s2841_s21, %s2841_s21, %s2842_s22  }
  0x26   :  { %2832 = dma.done.wait [#allocation5], 256  }
  0x27   :  { %2833 = vsyncadd [#allocation5], 4294967040 }
  0x28   :  { %2834 = dma.done.wait [#allocation8], 512  }
  0x29   :  { %2835 = vsyncadd [#allocation8], 4294966784  ;;  %v2847_v0 = vmov 0.0   ;;  %vm2848_vm0 = vmmov 0   ;;  %v2647_v1 = vld [vmem:[#allocation7 + $0x8] sm:$0xff]   ;;  %v2648_v2 = vld [vmem:[#allocation7] sm:$0xff]  }
  0x2a   :  { %2400 = vmatprep.subr.bf16.mxu0 %v2847_v0  ;;  %2404 = vmatprep.mubr.msk.bf16.mxu0 %vm2848_vm0, %v2847_v0  ;;  %v63_v3 = vld [vmem:[#allocation4] sm:$0xff]  ;;  %v64_v4 = vld [vmem:[#allocation4 + $0x8] sm:$0xff]  ;;  %vm82_vm1 = vcmask 261120   ;;  %vm135_vm2 = vcmask 781312   ;;  %s2849_s0 = smov 96   ;;  %vm145_vm3 = vcmask 31744  }
  0x2b   :  { %2408 = vmatprep.subr.bf16.mxu1 %v2847_v0  ;;  %2410 = vmatprep.mubr.msk.bf16.mxu1 %vm2848_vm0, %v2847_v0  ;;  %v65_v5 = vpack.c.bf16 %v64_v4, %v63_v3  ;;  %vm243_vm4 = vcmask 64512   ;;  %s2850_s2 = smov 92   ;;  %vm277_vm5 = vcmask 1043456   ;;  %s2851_s11 = smov 124   ;;  %vm377_vm6 = vcmask 27648  }
  0x2c   :  { %2401 = vmatpush3.bf16.msra.mxu0 %v2647_v1  ;;  %s2852_s12 = smov 60   ;;  %s2853_s13 = smov 88   ;;  %vm626_vm7 = vcmask 60448   ;;  %vm875_vm8 = vcmask 93248   ;;  %vm1124_vm9 = vcmask 126048   ;;  %vm1373_vm10 = vcmask 158848  }
  0x2d   :  { %2402 = vmatprep.subr.bf16.mxu0 %v2847_v0  ;;  %s2854_s14 = smov 120   ;;  %s2855_s15 = smov 56   ;;  %vm1622_vm11 = vcmask 191648   ;;  %vm1871_vm12 = vcmask 224448   ;;  %vm2125_vm13 = vcmask 57344   ;;  %vm2120_vm14 = vcmask 257248  }
  0x2e   :  { %s2856_s16 = smov 84   ;;  %s2857_s17 = smov 116  }
  0x2f   :  { %s2858_s18 = smov 52   ;;  %s2859_s19 = smov 80  }
  0x30   :  { %2403 = vmatpush3.bf16.msra.mxu0 %v2648_v2  ;;  %s2860_s20 = smov 112   ;;  %s2862_s23 = smov 76  }
  0x31   :  { %2414 = vmatprep.subr.bf16.mxu0 %v2847_v0  ;;  %s2863_s24 = smov 108   ;;  %s2864_s25 = smov 44  }
  0x32   :  { %s2865_s26 = smov 72   ;;  %s2866_s27 = smov 104  }
  0x33   :  { %2405 = vmatmul.mubr.msk.bf16.vlgmr.msra.gmra.mxu0 %vm82_vm1, %v65_v5  ;;  %s2867_s30 = smov 40   ;;  %s2868_s6 = smov 68  }
  0x34   :  { %2416 = vmatprep.mubr.msk.bf16.mxu0 %vm2848_vm0, %v2847_v0  ;;  %s2869_s1 = smov 100   ;;  %s2870_s7 = smov 36  }
  0x35   :  { %s2871_s8 = smov 12   ;;  %s2872_s9 = smov 16  }
  0x36   :  { %s2874_s10 = smov 24  }
  0xf3   :  { %v120_v6 = vpop.f32.mrf.mxu0 }
  0xf4   :  { %v2312_v7 = vpack.c.bf16 %v120_v6, %v120_v6 }
  0xf5   :  { %v2406_v8 = vpop.f32.mrf.mxu0 }
  0xf6   :  { %136 = vst.msk [vmem:[#allocation2] sm:$0xf] %vm135_vm2, %v2312_v7 }
  0xf7   :  { %v123_v9 = vpop.f32.mrf.mxu0 }
  0xf8   :  { %v2313_v10 = vpack.c.bf16 %v123_v9, %v123_v9 }
  0xf9   :  { %v2407_v11 = vpop.f32.mrf.mxu0 }
  0xfa   :  { %137 = vst.msk [vmem:[#allocation2 + $0x4] sm:$0xf] %vm135_vm2, %v2313_v10 }
  0xfd   :  { %v138_v12 = vld [vmem:[#allocation2] sm:$0xf] }
  0xfe   :  { %v2243_v13 = vcombine.low %v138_v12, %v138_v12  ;;  %v2952_v30 = vld [vmem:[#allocation2] ss:$0 sps:$4 sm:$0xff]  }
 0x100   :  { %143 = vrot.lane.b32.xlu0 %v2243_v13, %s2849_s0 }
 0x101   :  { %v139_v14 = vld [vmem:[#allocation2 + $0x4] sm:$0xf] }
 0x102   :  { %v2245_v15 = vcombine.low %v139_v14, %v139_v14  ;;  %v2652_v45 = vld [vmem:[#allocation2 + $0x4] ss:$0 sps:$4 sm:$0xff]  }
 0x104   :  { %195 = vrot.lane.b32.xlu0 %v2245_v15, %s2849_s0  ;;  %s2875_s0 = smov 28  }
 0x172   :  { %v144_v16 = vpop.permute.xlu0 %143 }
 0x173   :  { %v150_v17 = vsel %vm145_vm3, %v144_v16, 0 }
 0x174   :  { %2409 = vmatpush3.bf16.xpose.msra.mxu1 %v150_v17  ;;  %v2989_v17 = vld [vmem:[#allocation2] ss:$0 sps:$4 sm:$0xff]  }
 0x175   :  { %2420 = vmatprep.subr.bf16.mxu1 %v2847_v0 }
 0x176   :  { %v196_v18 = vpop.permute.xlu0 %195 }
 0x177   :  { %v201_v19 = vsel %vm145_vm3, %v196_v18, 0 }
 0x178   :  { %2415 = vmatpush3.bf16.xpose.msra.mxu0 %v201_v19 }
 0x179   :  { %2426 = vmatprep.subr.bf16.mxu0 %v2847_v0 }
 0x17b   :  { %2411 = vmatmul.mubr.msk.bf16.vlgmr.msra.gmra.mxu1 %vm145_vm3, %v138_v12 }
 0x17c   :  { %2422 = vmatprep.mubr.msk.bf16.mxu1 %vm2848_vm0, %v2847_v0 }
 0x17f   :  { %2417 = vmatmul.mubr.msk.bf16.vlgmr.msra.gmra.mxu0 %vm145_vm3, %v139_v14 }
 0x180   :  { %2428 = vmatprep.mubr.msk.bf16.mxu0 %vm2848_vm0, %v2847_v0 }
 0x23b   :  { %v186_v20 = vpop.f32.mrf.mxu1 }
 0x23c   :  { %v244_v21 = vsel %vm243_vm4, %v186_v20, -inf }
 0x23d   :  { %245 = vmax.xlane.f32.xlu1 %v244_v21  ;;  %v2412_v22 = vpop.f32.mrf.mxu1 }
 0x23f   :  { %v189_v23 = vpop.f32.mrf.mxu1  ;;  %v237_v24 = vpop.f32.mrf.mxu0 }
 0x240   :  { %v247_v25 = vsel %vm243_vm4, %v237_v24, -inf }
 0x241   :  { %v2413_v26 = vpop.f32.mrf.mxu1  ;;  %248 = vmax.xlane.f32.xlu1 %v247_v25  ;;  %v2418_v27 = vpop.f32.mrf.mxu0 }
 0x243   :  { %v240_v28 = vpop.f32.mrf.mxu0 }
 0x245   :  { %v2419_v29 = vpop.f32.mrf.mxu0 }
 0x252   :  { %272 = vrot.lane.b32.xlu1 %v2243_v13, %s2841_s21 }
 0x256   :  { %321 = vrot.lane.b32.xlu1 %v2245_v15, %s2841_s21  ;;  %s2861_s21 = smov 48  }
 0x25a   :  { %387 = vrot.lane.b32.xlu1 %v2952_v30, %s2850_s2 }
 0x2c6   :  { %v246_v31 = vpop.xlane.xlu1 %245 }
 0x2c7   :  { %v250_v32 = vsub.f32 %v186_v20, %v246_v31 }
 0x2c9   :  { %v252_v33 = vmul.f32 1.442695, %v250_v32  ;;  %v2999_v32 = vld [vmem:[#allocation2 + $0x4] ss:$0 sps:$4 sm:$0xff]  }
 0x2ca   :  { %v249_v34 = vpop.xlane.xlu1 %248 }
 0x2cb   :  { %2668 = vpow2.f32 %v252_v33  ;;  %v251_v35 = vsub.f32 %v237_v24, %v249_v34 }
 0x2cd   :  { %v254_v36 = vmul.f32 1.442695, %v251_v35 }
 0x2ce   :  { %v273_v37 = vpop.permute.xlu1 %272 }
 0x2cf   :  { %2670 = vpow2.f32 %v254_v36  ;;  %v279_v38 = vsel %vm277_vm5, %v273_v37, 0 }
 0x2d0   :  { %2421 = vmatpush3.bf16.msra.mxu1 %v279_v38 }
 0x2d1   :  { %2432 = vmatprep.subr.bf16.mxu1 %v2847_v0 }
 0x2d2   :  { %v322_v39 = vpop.permute.xlu1 %321 }
 0x2d3   :  { %v327_v40 = vsel %vm277_vm5, %v322_v39, 0 }
 0x2d4   :  { %2427 = vmatpush3.bf16.msra.mxu0 %v327_v40 }
 0x2d5   :  { %2438 = vmatprep.subr.bf16.mxu0 %v2847_v0 }
 0x2d6   :  { %v388_v46 = vpop.permute.xlu1 %387 }
 0x2d7   :  { %v393_v53 = vsel %vm145_vm3, %v388_v46, 0 }
 0x2d8   :  { %v2669_v41 = vpop.eup %2668 }
 0x2d9   :  { %v256_v42 = vsel %vm243_vm4, %v2669_v41, 0.0 }
 0x2da   :  { %257 = vadd.xlane.f32.xlu0 %v256_v42 }
 0x2dc   :  { %v2671_v43 = vpop.eup %2670 }
 0x2dd   :  { %v259_v44 = vsel %vm243_vm4, %v2671_v43, 0.0 }
 0x2de   :  { %260 = vadd.xlane.f32.xlu1 %v259_v44 }
 0x2ef   :  { %440 = vrot.lane.b32.xlu1 %v2652_v45, %s2850_s2  ;;  %s2876_s2 = smov [#allocation10]  }
 0x2f0   :  { %385 = vrot.lane.b32.xlu0 %v2952_v30, %s2851_s11 }
 0x2f3   :  { %438 = vrot.lane.b32.xlu1 %v2652_v45, %s2851_s11  ;;  %s2209_s11 = sshll.u32 %s2876_s2, 4  ;;  %s2210_s11 = int_to_ptr.vmem [resolvable:$true] %s2209_s11 }
 0x2f4   :  { %p2797_p2 = scmp.lt.s32.totalorder %s2210_s11, %s2210_s11 }
 0x363   :  { %v258_v47 = vpop.xlane.xlu0 %257 }
 0x364   :  { %2672 = vrcp.f32 %v258_v47 }
 0x367   :  { %v261_v48 = vpop.xlane.xlu1 %260  ;;  %v386_v58 = vpop.permute.xlu0 %385 }
 0x368   :  { %2674 = vrcp.f32 %v261_v48 }
 0x36b   :  { %v441_v55 = vpop.permute.xlu1 %440 }
 0x36c   :  { %v446_v57 = vsel %vm145_vm3, %v441_v55, 0 }
 0x36f   :  { %v439_v59 = vpop.permute.xlu1 %438 }
 0x371   :  { %v2673_v49 = vpop.eup %2672 }
 0x372   :  { %v2962_v50 = vmul.f32 %v2673_v49, %v2669_v41 }
 0x374   :  { %v270_v51 = vpack.c.bf16 %v2962_v50, %v2962_v50 }
 0x375   :  { %v2675_v52 = vpop.eup %2674 }
 0x376   :  { %2423 = vmatmul.mubr.msk.bf16.vlgmr.msra.gmra.mxu1 %vm243_vm4, %v270_v51  ;;  %v2968_v54 = vmul.f32 %v2675_v52, %v2671_v43 }
 0x377   :  { %2433 = vmatpush3.bf16.xpose.msra.mxu1 %v393_v53  ;;  %2434 = vmatprep.mubr.msk.bf16.mxu1 %vm2848_vm0, %v2847_v0 }
 0x378   :  { %v271_v56 = vpack.c.bf16 %v2968_v54, %v2968_v54  ;;  %2444 = vmatprep.subr.bf16.mxu1 %v2847_v0 }
 0x37a   :  { %2429 = vmatmul.mubr.msk.bf16.vlgmr.msra.gmra.mxu0 %vm243_vm4, %v271_v56 }
 0x37b   :  { %2439 = vmatpush3.bf16.xpose.msra.mxu0 %v446_v57  ;;  %2440 = vmatprep.mubr.msk.bf16.mxu0 %vm2848_vm0, %v2847_v0 }
 0x37c   :  { %2450 = vmatprep.subr.bf16.mxu0 %v2847_v0 }
 0x37e   :  { %2435 = vmatmul.mubr.msk.bf16.vlgmr.msra.gmra.mxu1 %vm145_vm3, %v386_v58 }
 0x37f   :  { %2446 = vmatprep.mubr.msk.bf16.mxu1 %vm2848_vm0, %v2847_v0 }
 0x382   :  { %2441 = vmatmul.mubr.msk.bf16.vlgmr.msra.gmra.mxu0 %vm145_vm3, %v439_v59 }
 0x383   :  { %2452 = vmatprep.mubr.msk.bf16.mxu0 %vm2848_vm0, %v2847_v0 }
 0x436   :  { %v315_v60 = vpop.f32.mrf.mxu1 }
 0x437   :  { %v2314_v61 = vpack.c.bf16 %v315_v60, %v315_v60 }
 0x438   :  { %v2424_v62 = vpop.f32.mrf.mxu1 }
 0x439   :  { %378 = vst.msk [vmem:[#allocation3] sm:$0xf] %vm377_vm6, %v2314_v61 }
 0x43a   :  { %v318_v63 = vpop.f32.mrf.mxu1  ;;  %v363_v1 = vpop.f32.mrf.mxu0 }
 0x43b   :  { %v2315_v2 = vpack.c.bf16 %v363_v1, %v363_v1 }
 0x43c   :  { %v2425_v3 = vpop.f32.mrf.mxu1  ;;  %v2430_v4 = vpop.f32.mrf.mxu0 }
 0x43d   :  { %379 = vst.msk [vmem:[#allocation3 + $0x4] sm:$0xf] %vm377_vm6, %v2315_v2  ;;  %v3034_v4 = vld [vmem:[#allocation2] ss:$0 sps:$4 sm:$0xff]  }
 0x43e   :  { %v366_v5 = vpop.f32.mrf.mxu0  ;;  %v429_v6 = vpop.f32.mrf.mxu1 }
 0x43f   :  { %v488_v7 = vsel %vm243_vm4, %v429_v6, -inf  ;;  %v3037_v5 = vld [vmem:[#allocation2 + $0x4] ss:$0 sps:$4 sm:$0xff]  }
 0x440   :  { %489 = vmax.xlane.f32.xlu1 %v488_v7  ;;  %v2431_v8 = vpop.f32.mrf.mxu0  ;;  %v2436_v9 = vpop.f32.mrf.mxu1 }
 0x442   :  { %v432_v10 = vpop.f32.mrf.mxu1  ;;  %v482_v11 = vpop.f32.mrf.mxu0 }
 0x443   :  { %v491_v12 = vsel %vm243_vm4, %v482_v11, -inf }
 0x444   :  { %v2437_v13 = vpop.f32.mrf.mxu1  ;;  %492 = vmax.xlane.f32.xlu0 %v491_v12  ;;  %v2442_v14 = vpop.f32.mrf.mxu0 }
 0x446   :  { %v485_v15 = vpop.f32.mrf.mxu0 }
 0x448   :  { %v2443_v16 = vpop.f32.mrf.mxu0 }
 0x451   :  { %518 = vrot.lane.b32.xlu1 %v2952_v30, %s2852_s12 }
 0x455   :  { %636 = vrot.lane.b32.xlu1 %v2989_v17, %s2853_s13 }
 0x45a   :  { %566 = vrot.lane.b32.xlu0 %v2652_v45, %s2852_s12  ;;  %s2792_s12 = scalar_lea.vmem %s2210_s11, 32 }
 0x45b   :  { %p2793_p1 = scmp.ne.s32.totalorder %s2210_s11, %s2792_s12  ;;  %p2798_p3 = scmp.lt.s32.totalorder %s2792_s12, %s2792_s12 }
 0x45d   :  { %p2799_p4 = por %p2798_p3, %p2797_p2 }
 0x45e   :  { %634 = vrot.lane.b32.xlu0 %v2989_v17, %s2854_s14 }
 0x45f   :  { %p2800_p5 = pnand %p2799_p4, %p2793_p1 }
 0x4c9   :  { %v490_v18 = vpop.xlane.xlu1 %489 }
 0x4ca   :  { %v494_v19 = vsub.f32 %v429_v6, %v490_v18 }
 0x4cc   :  { %v496_v20 = vmul.f32 1.442695, %v494_v19 }
 0x4cd   :  { %v519_v21 = vpop.permute.xlu1 %518  ;;  %v493_v22 = vpop.xlane.xlu0 %492 }
 0x4ce   :  { %2676 = vpow2.f32 %v496_v20  ;;  %v524_v23 = vsel %vm277_vm5, %v519_v21, 0  ;;  %v495_v24 = vsub.f32 %v482_v11, %v493_v22 }
 0x4cf   :  { %2445 = vmatpush3.bf16.msra.mxu1 %v524_v23 }
 0x4d0   :  { %v498_v25 = vmul.f32 1.442695, %v495_v24  ;;  %2456 = vmatprep.subr.bf16.mxu1 %v2847_v0 }
 0x4d1   :  { %v567_v26 = vpop.permute.xlu0 %566  ;;  %v637_v33 = vpop.permute.xlu1 %636 }
 0x4d2   :  { %2678 = vpow2.f32 %v498_v25  ;;  %v572_v27 = vsel %vm277_vm5, %v567_v26, 0  ;;  %v642_v40 = vsel %vm145_vm3, %v637_v33, 0 }
 0x4d3   :  { %2451 = vmatpush3.bf16.msra.mxu0 %v572_v27 }
 0x4d4   :  { %2462 = vmatprep.subr.bf16.mxu0 %v2847_v0 }
 0x4d5   :  { %v635_v45 = vpop.permute.xlu0 %634 }
 0x4db   :  { %v2677_v28 = vpop.eup %2676 }
 0x4dc   :  { %v500_v29 = vsel %vm243_vm4, %v2677_v28, 0.0 }
 0x4dd   :  { %501 = vadd.xlane.f32.xlu1 %v500_v29 }
 0x4df   :  { %v2679_v30 = vpop.eup %2678 }
 0x4e0   :  { %v503_v31 = vsel %vm243_vm4, %v2679_v30, 0.0 }
 0x4e1   :  { %504 = vadd.xlane.f32.xlu1 %v503_v31 }
 0x4f2   :  { %689 = vrot.lane.b32.xlu1 %v2999_v32, %s2853_s13 }
 0x4f6   :  { %687 = vrot.lane.b32.xlu1 %v2999_v32, %s2854_s14 }
 0x566   :  { %v502_v34 = vpop.xlane.xlu1 %501 }
 0x567   :  { %2680 = vrcp.f32 %v502_v34 }
 0x56a   :  { %v505_v35 = vpop.xlane.xlu1 %504 }
 0x56b   :  { %2682 = vrcp.f32 %v505_v35 }
 0x56e   :  { %v690_v42 = vpop.permute.xlu1 %689 }
 0x56f   :  { %v695_v44 = vsel %vm145_vm3, %v690_v42, 0 }
 0x572   :  { %v688_v46 = vpop.permute.xlu1 %687 }
 0x574   :  { %v2681_v36 = vpop.eup %2680 }
 0x575   :  { %v3003_v37 = vmul.f32 %v2681_v36, %v2677_v28 }
 0x577   :  { %v516_v38 = vpack.c.bf16 %v3003_v37, %v3003_v37  ;;  %v510_v24 = vadd.f32 %v3003_v37, %v2962_v50 }
 0x578   :  { %v2683_v39 = vpop.eup %2682 }
 0x579   :  { %2447 = vmatmul.mubr.msk.bf16.vlgmr.msra.gmra.mxu1 %vm243_vm4, %v516_v38  ;;  %v3009_v41 = vmul.f32 %v2683_v39, %v2679_v30 }
 0x57a   :  { %2457 = vmatpush3.bf16.xpose.msra.mxu1 %v642_v40  ;;  %2458 = vmatprep.mubr.msk.bf16.mxu1 %vm2848_vm0, %v2847_v0 }
 0x57b   :  { %v517_v43 = vpack.c.bf16 %v3009_v41, %v3009_v41  ;;  %2468 = vmatprep.subr.bf16.mxu1 %v2847_v0  ;;  %v511_v29 = vadd.f32 %v3009_v41, %v2968_v54 }
 0x57d   :  { %2453 = vmatmul.mubr.msk.bf16.vlgmr.msra.gmra.mxu0 %vm243_vm4, %v517_v43 }
 0x57e   :  { %2463 = vmatpush3.bf16.xpose.msra.mxu0 %v695_v44  ;;  %2464 = vmatprep.mubr.msk.bf16.mxu0 %vm2848_vm0, %v2847_v0 }
 0x57f   :  { %2474 = vmatprep.subr.bf16.mxu0 %v2847_v0 }
 0x581   :  { %2459 = vmatmul.mubr.msk.bf16.vlgmr.msra.gmra.mxu1 %vm145_vm3, %v635_v45 }
 0x582   :  { %2470 = vmatprep.mubr.msk.bf16.mxu1 %vm2848_vm0, %v2847_v0 }
 0x585   :  { %2465 = vmatmul.mubr.msk.bf16.vlgmr.msra.gmra.mxu0 %vm145_vm3, %v688_v46 }
 0x586   :  { %2476 = vmatprep.mubr.msk.bf16.mxu0 %vm2848_vm0, %v2847_v0 }
 0x639   :  { %v3027_v47 = vpop.f32.mrf.mxu1 }
 0x63b   :  { %v2448_v48 = vpop.f32.mrf.mxu1 }
 0x63d   :  { %v563_v49 = vpop.f32.mrf.mxu1  ;;  %v3029_v51 = vpop.f32.mrf.mxu0 }
 0x63f   :  { %v2449_v52 = vpop.f32.mrf.mxu1  ;;  %v2454_v53 = vpop.f32.mrf.mxu0 }
 0x641   :  { %v611_v55 = vpop.f32.mrf.mxu0  ;;  %v678_v56 = vpop.f32.mrf.mxu1 }
 0x642   :  { %v737_v57 = vsel %vm243_vm4, %v678_v56, -inf }
 0x643   :  { %738 = vmax.xlane.f32.xlu0 %v737_v57  ;;  %v2455_v58 = vpop.f32.mrf.mxu0  ;;  %v2460_v59 = vpop.f32.mrf.mxu1 }
 0x644   :  { %v3080_v58 = vld [vmem:[#allocation2] ss:$0 sps:$4 sm:$0xff]   ;;  %v3083_v59 = vld [vmem:[#allocation2 + $0x4] ss:$0 sps:$4 sm:$0xff]  }
 0x645   :  { %v681_v60 = vpop.f32.mrf.mxu1  ;;  %v731_v61 = vpop.f32.mrf.mxu0 }
 0x646   :  { %v740_v62 = vsel %vm243_vm4, %v731_v61, -inf }
 0x647   :  { %v2461_v63 = vpop.f32.mrf.mxu1  ;;  %741 = vmax.xlane.f32.xlu1 %v740_v62  ;;  %v2466_v1 = vpop.f32.mrf.mxu0 }
 0x649   :  { %v734_v2 = vpop.f32.mrf.mxu0 }
 0x64b   :  { %v2467_v3 = vpop.f32.mrf.mxu0 }
 0x658   :  { %767 = vrot.lane.b32.xlu1 %v2989_v17, %s2855_s15 }
 0x65c   :  { %885 = vrot.lane.b32.xlu1 %v3034_v4, %s2856_s16 }
 0x660   :  { %938 = vrot.lane.b32.xlu1 %v3037_v5, %s2856_s16 }
 0x664   :  { %936 = vrot.lane.b32.xlu1 %v3037_v5, %s2857_s17 }
 0x6cc   :  { %v739_v6 = vpop.xlane.xlu0 %738 }
 0x6cd   :  { %v743_v7 = vsub.f32 %v678_v56, %v739_v6 }
 0x6cf   :  { %v745_v8 = vmul.f32 1.442695, %v743_v7 }
 0x6d0   :  { %v742_v9 = vpop.xlane.xlu1 %741 }
 0x6d1   :  { %2684 = vpow2.f32 %v745_v8  ;;  %v744_v10 = vsub.f32 %v731_v61, %v742_v9 }
 0x6d3   :  { %v747_v11 = vmul.f32 1.442695, %v744_v10 }
 0x6d4   :  { %v768_v12 = vpop.permute.xlu1 %767 }
 0x6d5   :  { %2686 = vpow2.f32 %v747_v11  ;;  %v773_v13 = vsel %vm277_vm5, %v768_v12, 0 }
 0x6d6   :  { %2469 = vmatpush3.bf16.msra.mxu1 %v773_v13 }
 0x6d7   :  { %2480 = vmatprep.subr.bf16.mxu1 %v2847_v0 }
 0x6d8   :  { %v886_v23 = vpop.permute.xlu1 %885 }
 0x6d9   :  { %v891_v30 = vsel %vm145_vm3, %v886_v23, 0 }
 0x6de   :  { %v2685_v14 = vpop.eup %2684 }
 0x6df   :  { %v749_v15 = vsel %vm243_vm4, %v2685_v14, 0.0 }
 0x6e0   :  { %750 = vadd.xlane.f32.xlu0 %v749_v15 }
 0x6e2   :  { %v2687_v16 = vpop.eup %2686 }
 0x6e3   :  { %v752_v17 = vsel %vm243_vm4, %v2687_v16, 0.0 }
 0x6e4   :  { %753 = vadd.xlane.f32.xlu0 %v752_v17 }
 0x6fa   :  { %815 = vrot.lane.b32.xlu0 %v2999_v32, %s2855_s15  ;;  %v939_v32 = vpop.permute.xlu1 %938 }
 0x6fb   :  { %v944_v34 = vsel %vm145_vm3, %v939_v32, 0 }
 0x6fe   :  { %883 = vrot.lane.b32.xlu0 %v3034_v4, %s2857_s17  ;;  %v937_v35 = vpop.permute.xlu1 %936 }
 0x769   :  { %v751_v18 = vpop.xlane.xlu0 %750 }
 0x76a   :  { %2688 = vrcp.f32 %v751_v18 }
 0x76d   :  { %v754_v19 = vpop.xlane.xlu0 %753 }
 0x76e   :  { %2690 = vrcp.f32 %v754_v19 }
 0x771   :  { %v816_v20 = vpop.permute.xlu0 %815 }
 0x772   :  { %v821_v21 = vsel %vm277_vm5, %v816_v20, 0 }
 0x773   :  { %2475 = vmatpush3.bf16.msra.mxu0 %v821_v21 }
 0x774   :  { %2486 = vmatprep.subr.bf16.mxu0 %v2847_v0 }
 0x775   :  { %v884_v54 = vpop.permute.xlu0 %883 }
 0x777   :  { %v2689_v22 = vpop.eup %2688 }
 0x778   :  { %v756_v25 = vmul.f32 %v2689_v22, %v2685_v14 }
 0x77a   :  { %v3051_v26 = vadd.f32 %v756_v25, %v510_v24  ;;  %v765_v27 = vpack.c.bf16 %v756_v25, %v756_v25 }
 0x77b   :  { %v2691_v28 = vpop.eup %2690 }
 0x77c   :  { %2471 = vmatmul.mubr.msk.bf16.vlgmr.msra.gmra.mxu1 %vm243_vm4, %v765_v27  ;;  %v758_v31 = vmul.f32 %v2691_v28, %v2687_v16 }
 0x77d   :  { %2481 = vmatpush3.bf16.xpose.msra.mxu1 %v891_v30  ;;  %2482 = vmatprep.mubr.msk.bf16.mxu1 %vm2848_vm0, %v2847_v0 }
 0x77e   :  { %v3059_v33 = vadd.f32 %v758_v31, %v511_v29  ;;  %v766_v50 = vpack.c.bf16 %v758_v31, %v758_v31  ;;  %2492 = vmatprep.subr.bf16.mxu1 %v2847_v0 }
 0x780   :  { %2477 = vmatmul.mubr.msk.bf16.vlgmr.msra.gmra.mxu0 %vm243_vm4, %v766_v50 }
 0x781   :  { %2487 = vmatpush3.bf16.xpose.msra.mxu0 %v944_v34  ;;  %2488 = vmatprep.mubr.msk.bf16.mxu0 %vm2848_vm0, %v2847_v0 }
 0x782   :  { %2498 = vmatprep.subr.bf16.mxu0 %v2847_v0 }
 0x784   :  { %2483 = vmatmul.mubr.msk.bf16.vlgmr.msra.gmra.mxu1 %vm145_vm3, %v884_v54 }
 0x785   :  { %2494 = vmatprep.mubr.msk.bf16.mxu1 %vm2848_vm0, %v2847_v0 }
 0x788   :  { %2489 = vmatmul.mubr.msk.bf16.vlgmr.msra.gmra.mxu0 %vm145_vm3, %v937_v35 }
 0x789   :  { %2500 = vmatprep.mubr.msk.bf16.mxu0 %vm2848_vm0, %v2847_v0 }
 0x83c   :  { %v3073_v36 = vpop.f32.mrf.mxu1 }
 0x83e   :  { %v2472_v37 = vpop.f32.mrf.mxu1 }
 0x840   :  { %v812_v38 = vpop.f32.mrf.mxu1  ;;  %v3075_v39 = vpop.f32.mrf.mxu0 }
 0x842   :  { %v2473_v40 = vpop.f32.mrf.mxu1  ;;  %v2478_v41 = vpop.f32.mrf.mxu0 }
 0x844   :  { %v860_v42 = vpop.f32.mrf.mxu0  ;;  %v927_v43 = vpop.f32.mrf.mxu1 }
 0x845   :  { %v986_v44 = vsel %vm243_vm4, %v927_v43, -inf }
 0x846   :  { %987 = vmax.xlane.f32.xlu0 %v986_v44  ;;  %v2479_v45 = vpop.f32.mrf.mxu0  ;;  %v2484_v46 = vpop.f32.mrf.mxu1 }
 0x847   :  { %v3124_v45 = vld [vmem:[#allocation2] ss:$0 sps:$4 sm:$0xff]   ;;  %v3127_v46 = vld [vmem:[#allocation2 + $0x4] ss:$0 sps:$4 sm:$0xff]  }
 0x848   :  { %v930_v48 = vpop.f32.mrf.mxu1  ;;  %v980_v49 = vpop.f32.mrf.mxu0 }
 0x849   :  { %v989_v52 = vsel %vm243_vm4, %v980_v49, -inf }
 0x84a   :  { %v2485_v53 = vpop.f32.mrf.mxu1  ;;  %990 = vmax.xlane.f32.xlu1 %v989_v52  ;;  %v2490_v55 = vpop.f32.mrf.mxu0 }
 0x84c   :  { %v983_v56 = vpop.f32.mrf.mxu0 }
 0x84e   :  { %v2491_v57 = vpop.f32.mrf.mxu0 }
 0x85b   :  { %1016 = vrot.lane.b32.xlu1 %v3034_v4, %s2858_s18 }
 0x85f   :  { %1134 = vrot.lane.b32.xlu1 %v3080_v58, %s2859_s19 }
 0x863   :  { %1187 = vrot.lane.b32.xlu1 %v3083_v59, %s2859_s19 }
 0x867   :  { %1185 = vrot.lane.b32.xlu1 %v3083_v59, %s2860_s20 }
 0x8cf   :  { %v988_v60 = vpop.xlane.xlu0 %987 }
 0x8d0   :  { %v992_v61 = vsub.f32 %v927_v43, %v988_v60 }
 0x8d2   :  { %v994_v62 = vmul.f32 1.442695, %v992_v61 }
 0x8d3   :  { %v991_v63 = vpop.xlane.xlu1 %990 }
 0x8d4   :  { %2692 = vpow2.f32 %v994_v62  ;;  %v993_v1 = vsub.f32 %v980_v49, %v991_v63 }
 0x8d6   :  { %v996_v2 = vmul.f32 1.442695, %v993_v1 }
 0x8d7   :  { %v1017_v3 = vpop.permute.xlu1 %1016 }
 0x8d8   :  { %2694 = vpow2.f32 %v996_v2  ;;  %v1022_v4 = vsel %vm277_vm5, %v1017_v3, 0 }
 0x8d9   :  { %2493 = vmatpush3.bf16.msra.mxu1 %v1022_v4 }
 0x8da   :  { %2504 = vmatprep.subr.bf16.mxu1 %v2847_v0 }
 0x8db   :  { %v1135_v15 = vpop.permute.xlu1 %1134 }
 0x8dc   :  { %v1140_v19 = vsel %vm145_vm3, %v1135_v15, 0 }
 0x8df   :  { %v1188_v21 = vpop.permute.xlu1 %1187 }
 0x8e0   :  { %v1193_v24 = vsel %vm145_vm3, %v1188_v21, 0 }
 0x8e1   :  { %v2693_v6 = vpop.eup %2692 }
 0x8e2   :  { %v998_v7 = vsel %vm243_vm4, %v2693_v6, 0.0 }
 0x8e3   :  { %999 = vadd.xlane.f32.xlu0 %v998_v7 }
 0x8e5   :  { %v2695_v8 = vpop.eup %2694 }
 0x8e6   :  { %v1001_v9 = vsel %vm243_vm4, %v2695_v8, 0.0 }
 0x8e7   :  { %1002 = vadd.xlane.f32.xlu0 %v1001_v9 }
 0x8fd   :  { %1064 = vrot.lane.b32.xlu0 %v3037_v5, %s2858_s18 }
 0x901   :  { %1132 = vrot.lane.b32.xlu0 %v3080_v58, %s2860_s20 }
 0x96c   :  { %v1000_v10 = vpop.xlane.xlu0 %999 }
 0x96d   :  { %2696 = vrcp.f32 %v1000_v10 }
 0x970   :  { %v1003_v11 = vpop.xlane.xlu0 %1002 }
 0x971   :  { %2698 = vrcp.f32 %v1003_v11 }
 0x974   :  { %v1065_v12 = vpop.permute.xlu0 %1064 }
 0x975   :  { %v1070_v13 = vsel %vm277_vm5, %v1065_v12, 0 }
 0x976   :  { %2499 = vmatpush3.bf16.msra.mxu0 %v1070_v13 }
 0x977   :  { %2510 = vmatprep.subr.bf16.mxu0 %v2847_v0 }
 0x978   :  { %v1133_v25 = vpop.permute.xlu0 %1132 }
 0x97a   :  { %v2697_v14 = vpop.eup %2696 }
 0x97b   :  { %v1005_v16 = vmul.f32 %v2697_v14, %v2693_v6 }
 0x97d   :  { %v3096_v17 = vadd.f32 %v1005_v16, %v3051_v26  ;;  %v1014_v18 = vpack.c.bf16 %v1005_v16, %v1005_v16  ;;  %v1186_v26 = vpop.permute.xlu1 %1185 }
 0x97e   :  { %v2699_v5 = vpop.eup %2698 }
 0x97f   :  { %2495 = vmatmul.mubr.msk.bf16.vlgmr.msra.gmra.mxu1 %vm243_vm4, %v1014_v18  ;;  %v1007_v20 = vmul.f32 %v2699_v5, %v2695_v8 }
 0x980   :  { %2505 = vmatpush3.bf16.xpose.msra.mxu1 %v1140_v19  ;;  %2506 = vmatprep.mubr.msk.bf16.mxu1 %vm2848_vm0, %v2847_v0 }
 0x981   :  { %v3103_v22 = vadd.f32 %v1007_v20, %v3059_v33  ;;  %v1015_v23 = vpack.c.bf16 %v1007_v20, %v1007_v20  ;;  %2516 = vmatprep.subr.bf16.mxu1 %v2847_v0 }
 0x983   :  { %2501 = vmatmul.mubr.msk.bf16.vlgmr.msra.gmra.mxu0 %vm243_vm4, %v1015_v23 }
 0x984   :  { %2511 = vmatpush3.bf16.xpose.msra.mxu0 %v1193_v24  ;;  %2512 = vmatprep.mubr.msk.bf16.mxu0 %vm2848_vm0, %v2847_v0 }
 0x985   :  { %2522 = vmatprep.subr.bf16.mxu0 %v2847_v0 }
 0x987   :  { %2507 = vmatmul.mubr.msk.bf16.vlgmr.msra.gmra.mxu1 %vm145_vm3, %v1133_v25 }
 0x988   :  { %2518 = vmatprep.mubr.msk.bf16.mxu1 %vm2848_vm0, %v2847_v0 }
 0x98b   :  { %2513 = vmatmul.mubr.msk.bf16.vlgmr.msra.gmra.mxu0 %vm145_vm3, %v1186_v26 }
 0x98c   :  { %2524 = vmatprep.mubr.msk.bf16.mxu0 %vm2848_vm0, %v2847_v0 }
 0xa3f   :  { %v3117_v27 = vpop.f32.mrf.mxu1 }
 0xa41   :  { %v2496_v28 = vpop.f32.mrf.mxu1 }
 0xa43   :  { %v1061_v29 = vpop.f32.mrf.mxu1  ;;  %v3119_v30 = vpop.f32.mrf.mxu0 }
 0xa45   :  { %v2497_v31 = vpop.f32.mrf.mxu1  ;;  %v2502_v32 = vpop.f32.mrf.mxu0 }
 0xa47   :  { %v1109_v33 = vpop.f32.mrf.mxu0  ;;  %v1176_v50 = vpop.f32.mrf.mxu1 }
 0xa48   :  { %v1235_v34 = vsel %vm243_vm4, %v1176_v50, -inf }
 0xa49   :  { %1236 = vmax.xlane.f32.xlu0 %v1235_v34  ;;  %v2503_v54 = vpop.f32.mrf.mxu0  ;;  %v2508_v35 = vpop.f32.mrf.mxu1 }
 0xa4b   :  { %v1179_v37 = vpop.f32.mrf.mxu1  ;;  %v1229_v38 = vpop.f32.mrf.mxu0 }
 0xa4c   :  { %v1238_v40 = vsel %vm243_vm4, %v1229_v38, -inf  ;;  %v3168_v37 = vld [vmem:[#allocation2] ss:$0 sps:$4 sm:$0xff]  }
 0xa4d   :  { %v2509_v41 = vpop.f32.mrf.mxu1  ;;  %1239 = vmax.xlane.f32.xlu1 %v1238_v40  ;;  %v2514_v42 = vpop.f32.mrf.mxu0 }
 0xa4f   :  { %v1232_v43 = vpop.f32.mrf.mxu0 }
 0xa51   :  { %v2515_v44 = vpop.f32.mrf.mxu0 }
 0xa5e   :  { %1265 = vrot.lane.b32.xlu1 %v3080_v58, %s2861_s21 }
 0xa62   :  { %1383 = vrot.lane.b32.xlu1 %v3124_v45, %s2862_s23 }
 0xa66   :  { %1436 = vrot.lane.b32.xlu1 %v3127_v46, %s2862_s23 }
 0xa6a   :  { %1434 = vrot.lane.b32.xlu1 %v3127_v46, %s2863_s24 }
 0xad2   :  { %v1237_v48 = vpop.xlane.xlu0 %1236 }
 0xad3   :  { %v1241_v49 = vsub.f32 %v1176_v50, %v1237_v48 }
 0xad5   :  { %v1243_v52 = vmul.f32 1.442695, %v1241_v49 }
 0xad6   :  { %v1240_v53 = vpop.xlane.xlu1 %1239 }
 0xad7   :  { %2700 = vpow2.f32 %v1243_v52  ;;  %v1242_v55 = vsub.f32 %v1229_v38, %v1240_v53  ;;  %v3171_v38 = vld [vmem:[#allocation2 + $0x4] ss:$0 sps:$4 sm:$0xff]  }
 0xad9   :  { %v1245_v56 = vmul.f32 1.442695, %v1242_v55 }
 0xada   :  { %v1266_v57 = vpop.permute.xlu1 %1265 }
 0xadb   :  { %2702 = vpow2.f32 %v1245_v56  ;;  %v1271_v58 = vsel %vm277_vm5, %v1266_v57, 0 }
 0xadc   :  { %2517 = vmatpush3.bf16.msra.mxu1 %v1271_v58 }
 0xadd   :  { %2528 = vmatprep.subr.bf16.mxu1 %v2847_v0 }
 0xade   :  { %v1384_v7 = vpop.permute.xlu1 %1383 }
 0xadf   :  { %v1389_v11 = vsel %vm145_vm3, %v1384_v7, 0 }
 0xae2   :  { %v1437_v13 = vpop.permute.xlu1 %1436 }
 0xae3   :  { %v1442_v16 = vsel %vm145_vm3, %v1437_v13, 0 }
 0xae4   :  { %v2701_v60 = vpop.eup %2700 }
 0xae5   :  { %v1247_v61 = vsel %vm243_vm4, %v2701_v60, 0.0 }
 0xae6   :  { %1248 = vadd.xlane.f32.xlu0 %v1247_v61  ;;  %v1435_v18 = vpop.permute.xlu1 %1434 }
 0xae8   :  { %v2703_v62 = vpop.eup %2702 }
 0xae9   :  { %v1250_v63 = vsel %vm243_vm4, %v2703_v62, 0.0 }
 0xaea   :  { %1251 = vadd.xlane.f32.xlu0 %v1250_v63 }
 0xb00   :  { %1313 = vrot.lane.b32.xlu0 %v3083_v59, %s2861_s21 }
 0xb04   :  { %1381 = vrot.lane.b32.xlu0 %v3124_v45, %s2863_s24 }
 0xb6f   :  { %v1249_v1 = vpop.xlane.xlu0 %1248 }
 0xb70   :  { %2704 = vrcp.f32 %v1249_v1 }
 0xb73   :  { %v1252_v2 = vpop.xlane.xlu0 %1251 }
 0xb74   :  { %2706 = vrcp.f32 %v1252_v2 }
 0xb77   :  { %v1314_v3 = vpop.permute.xlu0 %1313 }
 0xb78   :  { %v1319_v4 = vsel %vm277_vm5, %v1314_v3, 0 }
 0xb79   :  { %2523 = vmatpush3.bf16.msra.mxu0 %v1319_v4 }
 0xb7a   :  { %2534 = vmatprep.subr.bf16.mxu0 %v2847_v0 }
 0xb7d   :  { %v2705_v6 = vpop.eup %2704 }
 0xb7e   :  { %v1254_v8 = vmul.f32 %v2705_v6, %v2701_v60 }
 0xb80   :  { %v3140_v9 = vadd.f32 %v1254_v8, %v3096_v17  ;;  %v1263_v10 = vpack.c.bf16 %v1254_v8, %v1254_v8  ;;  %v1382_v17 = vpop.permute.xlu0 %1381 }
 0xb81   :  { %v2707_v59 = vpop.eup %2706 }
 0xb82   :  { %2519 = vmatmul.mubr.msk.bf16.vlgmr.msra.gmra.mxu1 %vm243_vm4, %v1263_v10  ;;  %v1256_v12 = vmul.f32 %v2707_v59, %v2703_v62 }
 0xb83   :  { %2529 = vmatpush3.bf16.xpose.msra.mxu1 %v1389_v11  ;;  %2530 = vmatprep.mubr.msk.bf16.mxu1 %vm2848_vm0, %v2847_v0 }
 0xb84   :  { %v3147_v14 = vadd.f32 %v1256_v12, %v3103_v22  ;;  %v1264_v15 = vpack.c.bf16 %v1256_v12, %v1256_v12  ;;  %2540 = vmatprep.subr.bf16.mxu1 %v2847_v0 }
 0xb86   :  { %2525 = vmatmul.mubr.msk.bf16.vlgmr.msra.gmra.mxu0 %vm243_vm4, %v1264_v15 }
 0xb87   :  { %2535 = vmatpush3.bf16.xpose.msra.mxu0 %v1442_v16  ;;  %2536 = vmatprep.mubr.msk.bf16.mxu0 %vm2848_vm0, %v2847_v0 }
 0xb88   :  { %2546 = vmatprep.subr.bf16.mxu0 %v2847_v0 }
 0xb8a   :  { %2531 = vmatmul.mubr.msk.bf16.vlgmr.msra.gmra.mxu1 %vm145_vm3, %v1382_v17 }
 0xb8b   :  { %2542 = vmatprep.mubr.msk.bf16.mxu1 %vm2848_vm0, %v2847_v0 }
 0xb8e   :  { %2537 = vmatmul.mubr.msk.bf16.vlgmr.msra.gmra.mxu0 %vm145_vm3, %v1435_v18 }
 0xb8f   :  { %2548 = vmatprep.mubr.msk.bf16.mxu0 %vm2848_vm0, %v2847_v0 }
 0xc42   :  { %v3161_v5 = vpop.f32.mrf.mxu1 }
 0xc44   :  { %v2520_v19 = vpop.f32.mrf.mxu1 }
 0xc46   :  { %v1310_v20 = vpop.f32.mrf.mxu1  ;;  %v3163_v21 = vpop.f32.mrf.mxu0 }
 0xc48   :  { %v2521_v22 = vpop.f32.mrf.mxu1  ;;  %v2526_v23 = vpop.f32.mrf.mxu0 }
 0xc4a   :  { %v1358_v24 = vpop.f32.mrf.mxu0  ;;  %v1425_v25 = vpop.f32.mrf.mxu1 }
 0xc4b   :  { %v1484_v26 = vsel %vm243_vm4, %v1425_v25, -inf }
 0xc4c   :  { %1485 = vmax.xlane.f32.xlu0 %v1484_v26  ;;  %v2527_v28 = vpop.f32.mrf.mxu0  ;;  %v2532_v29 = vpop.f32.mrf.mxu1 }
 0xc4e   :  { %v1428_v31 = vpop.f32.mrf.mxu1  ;;  %v1478_v32 = vpop.f32.mrf.mxu0 }
 0xc4f   :  { %v1487_v33 = vsel %vm243_vm4, %v1478_v32, -inf }
 0xc50   :  { %v2533_v50 = vpop.f32.mrf.mxu1  ;;  %1488 = vmax.xlane.f32.xlu1 %v1487_v33  ;;  %v2538_v34 = vpop.f32.mrf.mxu0  ;;  %v3212_v33 = vld [vmem:[#allocation2] ss:$0 sps:$4 sm:$0xff]  }
 0xc51   :  { %v3215_v50 = vld [vmem:[#allocation2 + $0x4] ss:$0 sps:$4 sm:$0xff]  }
 0xc52   :  { %v1481_v54 = vpop.f32.mrf.mxu0 }
 0xc54   :  { %v2539_v35 = vpop.f32.mrf.mxu0 }
 0xc61   :  { %1514 = vrot.lane.b32.xlu1 %v3124_v45, %s2864_s25 }
 0xc65   :  { %1632 = vrot.lane.b32.xlu1 %v3168_v37, %s2865_s26 }
 0xc69   :  { %1685 = vrot.lane.b32.xlu1 %v3171_v38, %s2865_s26 }
 0xc6d   :  { %1683 = vrot.lane.b32.xlu1 %v3171_v38, %s2866_s27 }
 0xcd5   :  { %v1486_v40 = vpop.xlane.xlu0 %1485 }
 0xcd6   :  { %v1490_v41 = vsub.f32 %v1425_v25, %v1486_v40 }
 0xcd8   :  { %v1492_v42 = vmul.f32 1.442695, %v1490_v41 }
 0xcd9   :  { %v1489_v43 = vpop.xlane.xlu1 %1488 }
 0xcda   :  { %2708 = vpow2.f32 %v1492_v42  ;;  %v1491_v44 = vsub.f32 %v1478_v32, %v1489_v43 }
 0xcdc   :  { %v1494_v48 = vmul.f32 1.442695, %v1491_v44 }
 0xcdd   :  { %v1515_v45 = vpop.permute.xlu1 %1514 }
 0xcde   :  { %2710 = vpow2.f32 %v1494_v48  ;;  %v1520_v49 = vsel %vm277_vm5, %v1515_v45, 0 }
 0xcdf   :  { %2541 = vmatpush3.bf16.msra.mxu1 %v1520_v49 }
 0xce0   :  { %2552 = vmatprep.subr.bf16.mxu1 %v2847_v0 }
 0xce1   :  { %v1633_v63 = vpop.permute.xlu1 %1632 }
 0xce2   :  { %v1638_v4 = vsel %vm145_vm3, %v1633_v63, 0 }
 0xce5   :  { %v1686_v7 = vpop.permute.xlu1 %1685 }
 0xce7   :  { %v2709_v52 = vpop.eup %2708 }
 0xce8   :  { %v1496_v53 = vsel %vm243_vm4, %v2709_v52, 0.0 }
 0xce9   :  { %1497 = vadd.xlane.f32.xlu0 %v1496_v53  ;;  %v1684_v11 = vpop.permute.xlu1 %1683 }
 0xceb   :  { %v2711_v55 = vpop.eup %2710 }
 0xcec   :  { %v1499_v56 = vsel %vm243_vm4, %v2711_v55, 0.0 }
 0xced   :  { %1500 = vadd.xlane.f32.xlu0 %v1499_v56 }
 0xd03   :  { %1562 = vrot.lane.b32.xlu0 %v3127_v46, %s2864_s25 }
 0xd07   :  { %1630 = vrot.lane.b32.xlu0 %v3168_v37, %s2866_s27 }
 0xd72   :  { %v1498_v57 = vpop.xlane.xlu0 %1497 }
 0xd73   :  { %2712 = vrcp.f32 %v1498_v57 }
 0xd76   :  { %v1501_v58 = vpop.xlane.xlu0 %1500 }
 0xd77   :  { %2714 = vrcp.f32 %v1501_v58 }
 0xd7a   :  { %v1563_v60 = vpop.permute.xlu0 %1562 }
 0xd7b   :  { %v1568_v61 = vsel %vm277_vm5, %v1563_v60, 0 }
 0xd7c   :  { %2547 = vmatpush3.bf16.msra.mxu0 %v1568_v61 }
 0xd7d   :  { %2558 = vmatprep.subr.bf16.mxu0 %v2847_v0 }
 0xd7e   :  { %v1631_v59 = vpop.permute.xlu0 %1630 }
 0xd80   :  { %v2713_v62 = vpop.eup %2712 }
 0xd81   :  { %v1503_v1 = vmul.f32 %v2713_v62, %v2709_v52 }
 0xd83   :  { %v3184_v2 = vadd.f32 %v1503_v1, %v3140_v9  ;;  %v1512_v3 = vpack.c.bf16 %v1503_v1, %v1503_v1  ;;  %v1691_v9 = vsel %vm145_vm3, %v1686_v7, 0 }
 0xd84   :  { %v2715_v46 = vpop.eup %2714 }
 0xd85   :  { %2543 = vmatmul.mubr.msk.bf16.vlgmr.msra.gmra.mxu1 %vm243_vm4, %v1512_v3  ;;  %v1505_v6 = vmul.f32 %v2715_v46, %v2711_v55 }
 0xd86   :  { %2553 = vmatpush3.bf16.xpose.msra.mxu1 %v1638_v4  ;;  %2554 = vmatprep.mubr.msk.bf16.mxu1 %vm2848_vm0, %v2847_v0 }
 0xd87   :  { %v3191_v8 = vadd.f32 %v1505_v6, %v3147_v14  ;;  %v1513_v10 = vpack.c.bf16 %v1505_v6, %v1505_v6  ;;  %2564 = vmatprep.subr.bf16.mxu1 %v2847_v0 }
 0xd89   :  { %2549 = vmatmul.mubr.msk.bf16.vlgmr.msra.gmra.mxu0 %vm243_vm4, %v1513_v10 }
 0xd8a   :  { %2559 = vmatpush3.bf16.xpose.msra.mxu0 %v1691_v9  ;;  %2560 = vmatprep.mubr.msk.bf16.mxu0 %vm2848_vm0, %v2847_v0 }
 0xd8b   :  { %2570 = vmatprep.subr.bf16.mxu0 %v2847_v0 }
 0xd8d   :  { %2555 = vmatmul.mubr.msk.bf16.vlgmr.msra.gmra.mxu1 %vm145_vm3, %v1631_v59 }
 0xd8e   :  { %2566 = vmatprep.mubr.msk.bf16.mxu1 %vm2848_vm0, %v2847_v0 }
 0xd91   :  { %2561 = vmatmul.mubr.msk.bf16.vlgmr.msra.gmra.mxu0 %vm145_vm3, %v1684_v11 }
 0xd92   :  { %2572 = vmatprep.mubr.msk.bf16.mxu0 %vm2848_vm0, %v2847_v0 }
 0xe45   :  { %v3205_v12 = vpop.f32.mrf.mxu1 }
 0xe47   :  { %v2544_v13 = vpop.f32.mrf.mxu1 }
 0xe49   :  { %v1559_v14 = vpop.f32.mrf.mxu1  ;;  %v3207_v15 = vpop.f32.mrf.mxu0 }
 0xe4b   :  { %v2545_v16 = vpop.f32.mrf.mxu1  ;;  %v2550_v17 = vpop.f32.mrf.mxu0 }
 0xe4d   :  { %v1607_v18 = vpop.f32.mrf.mxu0  ;;  %v1674_v19 = vpop.f32.mrf.mxu1 }
 0xe4e   :  { %v1733_v20 = vsel %vm243_vm4, %v1674_v19, -inf }
 0xe4f   :  { %1734 = vmax.xlane.f32.xlu0 %v1733_v20  ;;  %v2551_v22 = vpop.f32.mrf.mxu0  ;;  %v2556_v23 = vpop.f32.mrf.mxu1 }
 0xe51   :  { %v1677_v24 = vpop.f32.mrf.mxu1  ;;  %v1727_v25 = vpop.f32.mrf.mxu0 }
 0xe52   :  { %v1736_v26 = vsel %vm243_vm4, %v1727_v25, -inf }
 0xe53   :  { %v2557_v28 = vpop.f32.mrf.mxu1  ;;  %1737 = vmax.xlane.f32.xlu1 %v1736_v26  ;;  %v2562_v29 = vpop.f32.mrf.mxu0 }
 0xe54   :  { %v2316_v29 = vpack.c.bf16 %v3027_v47, %v3027_v47  ;;  %v2323_v47 = vpack.c.bf16 %v3163_v21, %v3163_v21 }
 0xe55   :  { %v1730_v31 = vpop.f32.mrf.mxu0 }
 0xe56   :  { %v2317_v31 = vpack.c.bf16 %v3029_v51, %v3029_v51  ;;  %v2325_v51 = vpack.c.bf16 %v3207_v15, %v3207_v15 }
 0xe57   :  { %v2563_v32 = vpop.f32.mrf.mxu0 }
 0xe58   :  { %v2319_v32 = vpack.c.bf16 %v3075_v39, %v3075_v39 }
 0xe64   :  { %1763 = vrot.lane.b32.xlu1 %v3168_v37, %s2867_s30 }
 0xe68   :  { %1881 = vrot.lane.b32.xlu1 %v3212_v33, %s2868_s6 }
 0xe6c   :  { %1934 = vrot.lane.b32.xlu1 %v3215_v50, %s2868_s6 }
 0xe70   :  { %1932 = vrot.lane.b32.xlu1 %v3215_v50, %s2869_s1 }
 0xed8   :  { %v1735_v34 = vpop.xlane.xlu0 %1734 }
 0xed9   :  { %v1739_v54 = vsub.f32 %v1674_v19, %v1735_v34  ;;  %v2321_v34 = vpack.c.bf16 %v3119_v30, %v3119_v30 }
 0xedb   :  { %v1741_v35 = vmul.f32 1.442695, %v1739_v54 }
 0xedc   :  { %v1738_v40 = vpop.xlane.xlu1 %1737 }
 0xedd   :  { %2716 = vpow2.f32 %v1741_v35  ;;  %v1740_v41 = vsub.f32 %v1727_v25, %v1738_v40 }
 0xedf   :  { %v1743_v42 = vmul.f32 1.442695, %v1740_v41 }
 0xee0   :  { %v1764_v37 = vpop.permute.xlu1 %1763 }
 0xee1   :  { %2718 = vpow2.f32 %v1743_v42  ;;  %v1769_v43 = vsel %vm277_vm5, %v1764_v37, 0 }
 0xee2   :  { %2565 = vmatpush3.bf16.msra.mxu1 %v1769_v43 }
 0xee3   :  { %2576 = vmatprep.subr.bf16.mxu1 %v2847_v0 }
 0xee4   :  { %v1882_v58 = vpop.permute.xlu1 %1881 }
 0xee5   :  { %v1887_v63 = vsel %vm145_vm3, %v1882_v58, 0  ;;  %v2320_v58 = vpack.c.bf16 %v3117_v27, %v3117_v27 }
 0xee8   :  { %v1935_v3 = vpop.permute.xlu1 %1934 }
 0xeea   :  { %v2717_v44 = vpop.eup %2716 }
 0xeeb   :  { %v1745_v48 = vsel %vm243_vm4, %v2717_v44, 0.0 }
 0xeec   :  { %1746 = vadd.xlane.f32.xlu0 %v1745_v48  ;;  %v1933_v7 = vpop.permute.xlu1 %1932 }
 0xeee   :  { %v2719_v45 = vpop.eup %2718 }
 0xeef   :  { %v1748_v49 = vsel %vm243_vm4, %v2719_v45, 0.0 }
 0xef0   :  { %1749 = vadd.xlane.f32.xlu0 %v1748_v49 }
 0xf06   :  { %1811 = vrot.lane.b32.xlu0 %v3171_v38, %s2867_s30 }
 0xf0a   :  { %1879 = vrot.lane.b32.xlu0 %v3212_v33, %s2869_s1 }
 0xf75   :  { %v1747_v52 = vpop.xlane.xlu0 %1746 }
 0xf76   :  { %2720 = vrcp.f32 %v1747_v52 }
 0xf79   :  { %v1750_v53 = vpop.xlane.xlu0 %1749 }
 0xf7a   :  { %2722 = vrcp.f32 %v1750_v53 }
 0xf7d   :  { %v1812_v55 = vpop.permute.xlu0 %1811 }
 0xf7e   :  { %v1817_v56 = vsel %vm277_vm5, %v1812_v55, 0 }
 0xf7f   :  { %2571 = vmatpush3.bf16.msra.mxu0 %v1817_v56 }
 0xf80   :  { %2582 = vmatprep.subr.bf16.mxu0 %v2847_v0 }
 0xf81   :  { %v1880_v6 = vpop.permute.xlu0 %1879 }
 0xf83   :  { %v2721_v57 = vpop.eup %2720 }
 0xf84   :  { %v1752_v60 = vmul.f32 %v2721_v57, %v2717_v44  ;;  %v2318_v57 = vpack.c.bf16 %v3073_v36, %v3073_v36 }
 0xf86   :  { %v1761_v61 = vpack.c.bf16 %v1752_v60, %v1752_v60  ;;  %v3228_v62 = vadd.f32 %v1752_v60, %v3184_v2  ;;  %v1940_v2 = vsel %vm145_vm3, %v1935_v3, 0  ;;  %v2322_v60 = vpack.c.bf16 %v3161_v5, %v3161_v5 }
 0xf87   :  { %v2723_v38 = vpop.eup %2722 }
 0xf88   :  { %2567 = vmatmul.mubr.msk.bf16.vlgmr.msra.gmra.mxu1 %vm243_vm4, %v1761_v61  ;;  %v1754_v1 = vmul.f32 %v2723_v38, %v2719_v45  ;;  %v2324_v61 = vpack.c.bf16 %v3205_v12, %v3205_v12 }
 0xf89   :  { %2577 = vmatpush3.bf16.xpose.msra.mxu1 %v1887_v63  ;;  %2578 = vmatprep.mubr.msk.bf16.mxu1 %vm2848_vm0, %v2847_v0 }
 0xf8a   :  { %v1762_v46 = vpack.c.bf16 %v1754_v1, %v1754_v1  ;;  %2588 = vmatprep.subr.bf16.mxu1 %v2847_v0  ;;  %v3236_v4 = vadd.f32 %v1754_v1, %v3191_v8 }
 0xf8c   :  { %2573 = vmatmul.mubr.msk.bf16.vlgmr.msra.gmra.mxu0 %vm243_vm4, %v1762_v46 }
 0xf8d   :  { %2583 = vmatpush3.bf16.xpose.msra.mxu0 %v1940_v2  ;;  %2584 = vmatprep.mubr.msk.bf16.mxu0 %vm2848_vm0, %v2847_v0 }
 0xf8e   :  { %2594 = vmatprep.subr.bf16.mxu0 %v2847_v0 }
 0xf90   :  { %2579 = vmatmul.mubr.msk.bf16.vlgmr.msra.gmra.mxu1 %vm145_vm3, %v1880_v6 }
 0xf91   :  { %2590 = vmatprep.mubr.msk.bf16.mxu1 %vm2848_vm0, %v2847_v0 }
 0xf94   :  { %2585 = vmatmul.mubr.msk.bf16.vlgmr.msra.gmra.mxu0 %vm145_vm3, %v1933_v7 }
 0xf95   :  { %2596 = vmatprep.mubr.msk.bf16.mxu0 %vm2848_vm0, %v2847_v0 }
0x1048   :  { %v3249_v8 = vpop.f32.mrf.mxu1 }
0x1049   :  { %v2326_v36 = vpack.c.bf16 %v3249_v8, %v3249_v8 }
0x104a   :  { %v2568_v10 = vpop.f32.mrf.mxu1 }
0x104c   :  { %v1808_v9 = vpop.f32.mrf.mxu1  ;;  %v1853_v59 = vpop.f32.mrf.mxu0 }
0x104d   :  { %v2327_v39 = vpack.c.bf16 %v1853_v59, %v1853_v59 }
0x104e   :  { %v2569_v11 = vpop.f32.mrf.mxu1  ;;  %v2574_v13 = vpop.f32.mrf.mxu0 }
0x1050   :  { %v1856_v14 = vpop.f32.mrf.mxu0  ;;  %v1923_v16 = vpop.f32.mrf.mxu1 }
0x1051   :  { %v1982_v17 = vsel %vm243_vm4, %v1923_v16, -inf  ;;  %v2665_v14 = vld [vmem:[#allocation9 + $0x8] sm:$0xff]  }
0x1052   :  { %1983 = vmax.xlane.f32.xlu0 %v1982_v17  ;;  %v2575_v18 = vpop.f32.mrf.mxu0  ;;  %v2580_v19 = vpop.f32.mrf.mxu1 }
0x1054   :  { %v1926_v20 = vpop.f32.mrf.mxu1  ;;  %v1976_v22 = vpop.f32.mrf.mxu0 }
0x1055   :  { %v1985_v23 = vsel %vm243_vm4, %v1976_v22, -inf }
0x1056   :  { %v2581_v24 = vpop.f32.mrf.mxu1  ;;  %1986 = vmax.xlane.f32.xlu1 %v1985_v23  ;;  %v2586_v25 = vpop.f32.mrf.mxu0 }
0x1058   :  { %v1979_v26 = vpop.f32.mrf.mxu0 }
0x105a   :  { %v2587_v28 = vpop.f32.mrf.mxu0 }
0x1067   :  { %2012 = vrot.lane.b32.xlu1 %v3212_v33, %s2870_s7 }
0x106b   :  { %620 = vrot.lane.b32.xlu1 %v2316_v29, %s2842_s22 }
0x106f   :  { %622 = vrot.lane.b32.xlu1 %v2317_v31, %s2842_s22  ;;  %s2873_s22 = smov 20  }
0x1073   :  { %871 = vrot.lane.b32.xlu1 %v2319_v32, %s2845_s29 }
0x1077   :  { %1120 = vrot.lane.b32.xlu1 %v2321_v34, %s2871_s8 }
0x107b   :  { %1369 = vrot.lane.b32.xlu1 %v2323_v47, %s2872_s9 }
0x107f   :  { %1618 = vrot.lane.b32.xlu1 %v2325_v51, %s2873_s22 }
0x1083   :  { %1867 = vrot.lane.b32.xlu1 %v2327_v39, %s2874_s10 }
0x10db   :  { %v1984_v30 = vpop.xlane.xlu0 %1983 }
0x10dc   :  { %v1988_v33 = vsub.f32 %v1923_v16, %v1984_v30  ;;  %v2666_v16 = vld [vmem:[#allocation9] sm:$0xff]  }
0x10de   :  { %v1990_v54 = vmul.f32 1.442695, %v1988_v33 }
0x10df   :  { %v1987_v35 = vpop.xlane.xlu1 %1986 }
0x10e0   :  { %2724 = vpow2.f32 %v1990_v54  ;;  %v1989_v40 = vsub.f32 %v1976_v22, %v1987_v35 }
0x10e2   :  { %v1992_v21 = vmul.f32 1.442695, %v1989_v40 }
0x10e3   :  { %v2013_v41 = vpop.permute.xlu1 %2012 }
0x10e4   :  { %2726 = vpow2.f32 %v1992_v21  ;;  %v2018_v42 = vsel %vm277_vm5, %v2013_v41, 0 }
0x10e5   :  { %2589 = vmatpush3.bf16.msra.mxu1 %v2018_v42 }
0x10e6   :  { %2600 = vmatprep.subr.bf16.mxu1 %v2847_v0 }
0x10e7   :  { %v621_v15 = vpop.permute.xlu1 %620 }
0x10e8   :  { %627 = vst.msk [vmem:[#allocation3] sm:$0xf] %vm626_vm7, %v621_v15 }
0x10eb   :  { %v623_v37 = vpop.permute.xlu1 %622 }
0x10ec   :  { %628 = vst.msk [vmem:[#allocation3 + $0x4] sm:$0xf] %vm626_vm7, %v623_v37 }
0x10ed   :  { %v2725_v43 = vpop.eup %2724 }
0x10ee   :  { %v1994_v44 = vsel %vm243_vm4, %v2725_v43, 0.0 }
0x10ef   :  { %1995 = vadd.xlane.f32.xlu0 %v1994_v44  ;;  %v872_v48 = vpop.permute.xlu1 %871 }
0x10f0   :  { %877 = vst.msk [vmem:[#allocation3 + $0x4] sm:$0xf] %vm875_vm8, %v872_v48 }
0x10f1   :  { %v2727_v45 = vpop.eup %2726 }
0x10f2   :  { %v1997_v49 = vsel %vm243_vm4, %v2727_v45, 0.0 }
0x10f3   :  { %1998 = vadd.xlane.f32.xlu0 %v1997_v49  ;;  %v1121_v52 = vpop.permute.xlu1 %1120 }
0x10f4   :  { %1126 = vst.msk [vmem:[#allocation3 + $0x4] sm:$0xf] %vm1124_vm9, %v1121_v52 }
0x10f7   :  { %v1370_v53 = vpop.permute.xlu1 %1369 }
0x10f8   :  { %1375 = vst.msk [vmem:[#allocation3 + $0x4] sm:$0xf] %vm1373_vm10, %v1370_v53 }
0x10fb   :  { %v1619_v55 = vpop.permute.xlu1 %1618 }
0x10fc   :  { %1624 = vst.msk [vmem:[#allocation3 + $0x4] sm:$0xf] %vm1622_vm11, %v1619_v55 }
0x10ff   :  { %v1868_v56 = vpop.permute.xlu1 %1867 }
0x1100   :  { %1873 = vst.msk [vmem:[#allocation3 + $0x4] sm:$0xf] %vm1871_vm12, %v1868_v56 }
0x1109   :  { %2060 = vrot.lane.b32.xlu0 %v3215_v50, %s2870_s7 }
0x110d   :  { %869 = vrot.lane.b32.xlu0 %v2318_v57, %s2845_s29 }
0x1111   :  { %1118 = vrot.lane.b32.xlu0 %v2320_v58, %s2871_s8 }
0x1115   :  { %1367 = vrot.lane.b32.xlu0 %v2322_v60, %s2872_s9 }
0x1119   :  { %1616 = vrot.lane.b32.xlu0 %v2324_v61, %s2873_s22 }
0x111d   :  { %1865 = vrot.lane.b32.xlu0 %v2326_v36, %s2874_s10 }
0x1178   :  { %v1996_v50 = vpop.xlane.xlu0 %1995 }
0x1179   :  { %2728 = vrcp.f32 %v1996_v50 }
0x117c   :  { %v1999_v27 = vpop.xlane.xlu0 %1998 }
0x117d   :  { %2730 = vrcp.f32 %v1999_v27 }
0x1180   :  { %v2061_v38 = vpop.permute.xlu0 %2060 }
0x1181   :  { %v2066_v63 = vsel %vm277_vm5, %v2061_v38, 0 }
0x1182   :  { %2595 = vmatpush3.bf16.msra.mxu0 %v2066_v63 }
0x1184   :  { %v870_v5 = vpop.permute.xlu0 %869 }
0x1185   :  { %876 = vst.msk [vmem:[#allocation3] sm:$0xf] %vm875_vm8, %v870_v5 }
0x1186   :  { %v2729_v1 = vpop.eup %2728 }
0x1187   :  { %v2001_v12 = vmul.f32 %v2729_v1, %v2725_v43 }
0x1188   :  { %v1119_v3 = vpop.permute.xlu0 %1118 }
0x1189   :  { %1125 = vst.msk [vmem:[#allocation3] sm:$0xf] %vm1124_vm9, %v1119_v3  ;;  %v2010_v46 = vpack.c.bf16 %v2001_v12, %v2001_v12  ;;  %v2004_v2 = vadd.f32 %v2001_v12, %v3228_v62 }
0x118a   :  { %v2731_v6 = vpop.eup %2730 }
0x118b   :  { %2591 = vmatmul.mubr.msk.bf16.vlgmr.msra.gmra.mxu1 %vm243_vm4, %v2010_v46  ;;  %v2003_v7 = vmul.f32 %v2731_v6, %v2727_v45  ;;  %v2123_v8 = vmul.f32 0.125, %v2004_v2 }
0x118c   :  { %v1368_v10 = vpop.permute.xlu0 %1367  ;;  %2604 = vmatprep.mubr.msk.bf16.mxu1 %vm2848_vm0, %v2847_v0  ;;  %2601 = vmatpush3.bf16.msra.mxu1 %v2665_v14 }
0x118d   :  { %1374 = vst.msk [vmem:[#allocation3] sm:$0xf] %vm1373_vm10, %v1368_v10  ;;  %v2011_v9 = vpack.c.bf16 %v2003_v7, %v2003_v7  ;;  %v2005_v59 = vadd.f32 %v2003_v7, %v3236_v4  ;;  %2602 = vmatprep.subr.bf16.mxu1 %v2847_v0 }
0x118e   :  { %2126 = vst.msk [vmem:[#allocation10] sm:$0x1] %vm2125_vm13, %v2123_v8 }
0x118f   :  { %2597 = vmatmul.mubr.msk.bf16.vlgmr.msra.gmra.mxu0 %vm243_vm4, %v2011_v9  ;;  %v2124_v11 = vmul.f32 0.125, %v2005_v59 }
0x1190   :  { %v1617_v62 = vpop.permute.xlu0 %1616  ;;  %2603 = vmatpush3.bf16.msra.mxu1 %v2666_v16 }
0x1191   :  { %1623 = vst.msk [vmem:[#allocation3] sm:$0xf] %vm1622_vm11, %v1617_v62 }
0x1192   :  { %2127 = vst.msk [vmem:[#allocation10 + $0x1] sm:$0x1] %vm2125_vm13, %v2124_v11 }
0x1194   :  { %v1866_v13 = vpop.permute.xlu0 %1865 }
0x1195   :  { %1872 = vst.msk [vmem:[#allocation3] sm:$0xf] %vm1871_vm12, %v1866_v13 }
0x124b   :  { %v2054_v17 = vpop.f32.mrf.mxu1 }
0x124c   :  { %v2328_v18 = vpack.c.bf16 %v2054_v17, %v2054_v17 }
0x124d   :  { %v2592_v4 = vpop.f32.mrf.mxu1 }
0x124e   :  { %2114 = vrot.lane.b32.xlu0 %v2328_v18, %s2875_s0 }
0x124f   :  { %v2057_v19 = vpop.f32.mrf.mxu1  ;;  %v2102_v20 = vpop.f32.mrf.mxu0 }
0x1250   :  { %v2329_v22 = vpack.c.bf16 %v2102_v20, %v2102_v20 }
0x1251   :  { %v2593_v23 = vpop.f32.mrf.mxu1  ;;  %v2598_v24 = vpop.f32.mrf.mxu0 }
0x1252   :  { %2116 = vrot.lane.b32.xlu1 %v2329_v22, %s2875_s0 }
0x1253   :  { %v2105_v25 = vpop.f32.mrf.mxu0 }
0x1255   :  { %v2599_v26 = vpop.f32.mrf.mxu0 }
0x12c0   :  { %v2115_v28 = vpop.permute.xlu0 %2114 }
0x12c1   :  { %2121 = vst.msk [vmem:[#allocation3] sm:$0xf] %vm2120_vm14, %v2115_v28 }
0x12c4   :  { %v2117_v29 = vpop.permute.xlu1 %2116 }
0x12c5   :  { %2122 = vst.msk [vmem:[#allocation3 + $0x4] sm:$0xf] %vm2120_vm14, %v2117_v29 }
0x12cc   :  { %v2667_v0 = vld [vmem:[#allocation3] sm:$0xff]  }
0x12cd   :  { %2605 = vmatmul.mubr.msk.bf16.vlgmr.msra.gmra.mxu1 %vm82_vm1, %v2667_v0 }
0x12ce   :  { %2803 = shalt.err (!%p2800_p5)
}
0x12cf   :  { %s2877_s13 = smov 1   ;;  %v2307_v31 = vld [vmem:[%s3333_s3] ss:$0 sm:$0xff]  ;;  %s2878_s18 = smov [#allocation11]  }
0x12d0   :  { %2215 = dma.vmem_to_hbm [thread:$0]  %s2210_s11, 32, %s3334_s4, [#allocation6], %s2872_s9, %s2872_s9, %s2877_s13  }
0x12d1   :  { %s2221_s19 = sshll.u32 %s2878_s18, 4  ;;  %s2222_s19 = int_to_ptr.vmem [resolvable:$true] %s2221_s19 }
0x12d2   :  { %s2812_s20 = scalar_lea.vmem %s2222_s19, 256  ;;  %p2817_p7 = scmp.lt.s32.totalorder %s2222_s19, %s2222_s19 }
0x12d3   :  { %p2813_p6 = scmp.ne.s32.totalorder %s2222_s19, %s2812_s20  ;;  %p2818_p8 = scmp.lt.s32.totalorder %s2812_s20, %s2812_s20 }
0x12d5   :  { %p2819_p9 = por %p2818_p8, %p2817_p7 }
0x12d7   :  { %p2820_p10 = pnand %p2819_p9, %p2813_p6 }
0x138d   :  { %v2195_v32 = vpop.f32.mrf.mxu1 }
0x138e   :  { %v2196_v34 = vadd.f32 %v2307_v31, %v2195_v32 }
0x138f   :  { %v2606_v47 = vpop.f32.mrf.mxu1 }
0x1390   :  { %2202 = vst.msk [vmem:[#allocation11] sm:$0xff] %vm82_vm1, %v2196_v34 }
0x1391   :  { %v2198_v51 = vpop.f32.mrf.mxu1 }
0x1392   :  { %v2199_v39 = vadd.f32 %v2307_v31, %v2198_v51 }
0x1393   :  { %v2607_v30 = vpop.f32.mrf.mxu1 }
0x1394   :  { %2203 = vst.msk [vmem:[#allocation11 + $0x8] sm:$0xff] %vm82_vm1, %v2199_v39 }
0x1395   :  { %2823 = shalt.err (!%p2820_p10)
}
0x1396   :  { %2227 = dma.vmem_to_hbm [thread:$0]  %s2222_s19, 256, %s3335_s5, [#allocation12], %s2844_s28, %s2844_s28, %s2845_s29  }
0x1397   :  { %2836 = dma.done.wait [#allocation6], 32  }
0x1398   :  { %2837 = vsyncadd [#allocation6], 4294967264 }
0x1399   :  { %2838 = dma.done.wait [#allocation12], 256  }
0x139a   :  { %2839 = vsyncadd [#allocation12], 4294967040 }
0x139b   :  { %2234 = vsyncpa [#allocation5], 1 }
0x139c   :  { %2235 = vsyncpa [#allocation8], 1 }
0x139d   :  { %2236 = vsyncpa [#allocation6], 1 }
0x139e   :  { %2237 = vsyncpa [#allocation12], 1 }

</bundles_post_ra>
